<compile_context>
chip_gen: v6e
topology: v6e:2x2x1
jax: 0.10.0
libtpu: 0.0.40
codegen_flags: <defaults>
</compile_context>

<pallas_src>
import math
import functools

import jax
import jax.numpy as jnp
from jax.experimental import pallas as pl
from jax.experimental.pallas import tpu as pltpu


# ----------------------------------------------------------------------------
# Fused per-layer LSTM kernel  (grid = (batch_tiles, layers))
# ----------------------------------------------------------------------------

def _lstm_layer_kernel(x_ref, w_ih_ref, w_hh_ref, b_ref, out_ref,
                       seq_buf, gates_buf, *, T, Bb, Hp):
    """One (batch tile, layer) grid step: full T-step recurrence for one layer.

    x_ref     : (1, T*Bb, Hp) bf16  time-major tile of the embeddings (layer-0 input)
    w_ih_ref  : (1, Hp, 4Hp)  bf16  this layer's input->gates weights (i,f,g,o on lanes)
    w_hh_ref  : (1, Hp, 4Hp)  bf16  this layer's hidden->gates weights
    b_ref     : (1, 1, 4Hp)   f32   b_ih + b_hh combined
    out_ref   : (1, Bb, Hp)   f32   h_T of the TOP layer == output[:, -1, :]
    seq_buf   : VMEM (T*Bb, Hp) bf16  layer-to-layer sequence buffer (persists across layers)
    gates_buf : VMEM (T*Bb, 4Hp) f32  whole-sequence gate pre-activations for this layer
    """
    layer = pl.program_id(1)
    last_layer = pl.num_programs(1) - 1

    w_ih = w_ih_ref[0]                                      # (Hp, 4Hp) bf16
    w_hh = w_hh_ref[0]                                      # (Hp, 4Hp) bf16
    bias = b_ref[0]                                         # (1, 4Hp)  f32

    # (1) Whole-sequence input projection + bias: one lane-dense bf16 MXU matmul
    #     (f32 accumulation) instead of T small per-step matmuls.
    @pl.when(layer == 0)
    def _():
        gates_buf[...] = jnp.dot(x_ref[0], w_ih,
                                 preferred_element_type=jnp.float32) + bias

    @pl.when(layer > 0)
    def _():
        gates_buf[...] = jnp.dot(seq_buf[...], w_ih,
                                 preferred_element_type=jnp.float32) + bias

    # (2) Sequential recurrence: only h_{t-1} @ W_hh + gate nonlinearities per step.
    def step(t, carry):
        h, c = carry
        row = pl.multiple_of(t * Bb, Bb)                    # sublane-aligned dynamic offset
        g = gates_buf[pl.ds(row, Bb), :] + jnp.dot(
            h.astype(jnp.bfloat16), w_hh, preferred_element_type=jnp.float32)
        # Hp is a multiple of 128 -> each gate slice is a full lane-aligned block.
        i_g = jax.nn.sigmoid(g[:, 0 * Hp:1 * Hp])
        f_g = jax.nn.sigmoid(g[:, 1 * Hp:2 * Hp])
        g_g = jnp.tanh(g[:, 2 * Hp:3 * Hp])
        o_g = jax.nn.sigmoid(g[:, 3 * Hp:4 * Hp])
        c = f_g * c + i_g * g_g
        h = o_g * jnp.tanh(c)
        seq_buf[pl.ds(row, Bb), :] = h.astype(jnp.bfloat16)  # next layer's input
        return (h, c)

    zeros = jnp.zeros((Bb, Hp), jnp.float32)                # h_0 = c_0 = 0 (PyTorch default)
    h_last, _ = jax.lax.fori_loop(0, T, step, (zeros, zeros), unroll=min(T, 8))

    @pl.when(layer == last_layer)
    def _():
        out_ref[0] = h_last


# ----------------------------------------------------------------------------
# Wrapper: parameter packing, padding, BlockSpecs
# ----------------------------------------------------------------------------

def _round_up(x, m):
    return ((x + m - 1) // m) * m


def _pick_block_b(B, max_tile=256):
    """Sublane-aligned batch tile; big tiles fill the MXU, >=2 tiles keep both v7x TCs busy."""
    Bp = _round_up(B, 8)
    if Bp <= max_tile:
        return Bp                               # single tile, no wasted padding
    if Bp <= 2 * max_tile:
        return _round_up(pl.cdiv(Bp, 2), 8)     # two tiles -> both v7x TensorCores busy
    return max_tile


def _pick_vmem_limit():
    try:
        cap = pltpu.get_tpu_info().vmem_capacity_bytes
        cap = int(cap) if cap else 64 * 1024 * 1024
    except Exception:                            # conservative fallback (v7x-sized)
        cap = 64 * 1024 * 1024
    return int(cap * 0.85)                       # leave pipeline headroom


def _pack_gate_weight(w, H, Hp):
    """PyTorch (4H, H) [i;f;g;o] -> (Hp, 4Hp) for x @ W with each gate on its own 128-lane block."""
    w4 = w.reshape(4, H, H)                      # (gate, H_out, H_in)
    w4 = jnp.transpose(w4, (2, 0, 1))            # (H_in, gate, H_out)
    w4 = jnp.pad(w4, ((0, Hp - H), (0, 0), (0, Hp - H)))
    return w4.reshape(Hp, 4 * Hp)


def _pack_gate_bias(b, H, Hp):
    b4 = jnp.pad(b.reshape(4, H), ((0, 0), (0, Hp - H)))
    return b4.reshape(1, 4 * Hp)


def lstm_last_hidden(x, params, *, block_b=None):
    """Pallas equivalent of `LSTMTextEncoder.forward`:
    output, _ = nn.LSTM(emb, emb, num_layers=L, batch_first=True)(x); return output[:, -1, :]

    x      : (B, T, H) float32
    params : list (length L) of dicts with PyTorch-layout tensors
             w_ih (4H, H), w_hh (4H, H), b_ih (4H,), b_hh (4H,)
    """
    B, T, H = x.shape
    L = len(params)
    Hp = max(128, _round_up(H, 128))             # lane-aligned hidden dim (zero padded)
    Gp = 4 * Hp

    if block_b is None:
        block_b = _pick_block_b(B)
    nb = pl.cdiv(B, block_b)
    Bp = nb * block_b

    # Pack weights: gate k occupies lanes [k*Hp, (k+1)*Hp); padded rows/cols are zero so the
    # padded hidden units stay exactly 0 through every layer/timestep.
    w_ih = jnp.stack([_pack_gate_weight(p["w_ih"], H, Hp) for p in params]
                     ).astype(jnp.bfloat16)                                   # (L, Hp, 4Hp)
    w_hh = jnp.stack([_pack_gate_weight(p["w_hh"], H, Hp) for p in params]
                     ).astype(jnp.bfloat16)                                   # (L, Hp, 4Hp)
    bias = jnp.stack([_pack_gate_bias(p["b_ih"] + p["b_hh"], H, Hp)
                      for p in params]).astype(jnp.float32)                   # (L, 1, 4Hp)

    # bf16 input, zero-padded batch rows (independent, sliced off at the end) and hidden lanes.
    xp = jnp.pad(x.astype(jnp.bfloat16), ((0, Bp - B), (0, 0), (0, Hp - H)))
    # (Bp,T,Hp) -> (nb, T*block_b, Hp): per tile, time-major with batch contiguous per step.
    # TODO(synk): fold this transpose into the pipeline to avoid the extra HBM round trip of x.
    xp = xp.reshape(nb, block_b, T, Hp).transpose(0, 2, 1, 3).reshape(nb, T * block_b, Hp)

    kernel = functools.partial(_lstm_layer_kernel, T=T, Bb=block_b, Hp=Hp)
    out = pl.pallas_call(
        kernel,
        out_shape=jax.ShapeDtypeStruct((nb, block_b, Hp), jnp.float32),
        grid=(nb, L),                                      # batch tiles (parallel) x layers (serial)
        in_specs=[
            pl.BlockSpec((1, T * block_b, Hp), lambda b, l: (b, 0, 0)),   # x (fetched once per tile)
            pl.BlockSpec((1, Hp, Gp), lambda b, l: (l, 0, 0)),            # this layer's W_ih
            pl.BlockSpec((1, Hp, Gp), lambda b, l: (l, 0, 0)),            # this layer's W_hh
            pl.BlockSpec((1, 1, Gp), lambda b, l: (l, 0, 0)),             # this layer's bias
        ],
        out_specs=pl.BlockSpec((1, block_b, Hp), lambda b, l: (b, 0, 0)),
        scratch_shapes=[
            pltpu.VMEM((T * block_b, Hp), jnp.bfloat16),   # layer-to-layer sequence buffer
            pltpu.VMEM((T * block_b, Gp), jnp.float32),    # whole-sequence gate pre-activations
            # TODO(synk): chunk gates_buf over T for very long sequences.
        ],
        compiler_params=pltpu.CompilerParams(
            dimension_semantics=("parallel", "arbitrary"),
            vmem_limit_bytes=_pick_vmem_limit(),
        ),
    )(xp, w_ih, w_hh, bias)

    return out.reshape(Bp, Hp)[:B, :H]


# ----------------------------------------------------------------------------
# Pure-JAX reference (PyTorch nn.LSTM semantics) + parameter init
# ----------------------------------------------------------------------------

def lstm_ref(x, params):
    B, T, H = x.shape
    seq = x
    for p in params:
        h = jnp.zeros((B, H), jnp.float32)
        c = jnp.zeros((B, H), jnp.float32)
        outs = []
        for t in range(T):
            g = seq[:, t, :] @ p["w_ih"].T + p["b_ih"] + h @ p["w_hh"].T + p["b_hh"]
            i_g, f_g, g_g, o_g = jnp.split(g, 4, axis=-1)
            c = jax.nn.sigmoid(f_g) * c + jax.nn.sigmoid(i_g) * jnp.tanh(g_g)
            h = jax.nn.sigmoid(o_g) * jnp.tanh(c)
            outs.append(h)
        seq = jnp.stack(outs, axis=1)
    return seq[:, -1, :]


def init_lstm_params(key, emb_size, n_layers):
    k = 1.0 / math.sqrt(emb_size)
    keys = jax.random.split(key, n_layers * 4)
    params = []
    for l in range(n_layers):
        k0, k1, k2, k3 = keys[4 * l:4 * l + 4]
        params.append({
            "w_ih": jax.random.uniform(k0, (4 * emb_size, emb_size), jnp.float32, -k, k),
            "w_hh": jax.random.uniform(k1, (4 * emb_size, emb_size), jnp.float32, -k, k),
            "b_ih": jax.random.uniform(k2, (4 * emb_size,), jnp.float32, -k, k),
            "b_hh": jax.random.uniform(k3, (4 * emb_size,), jnp.float32, -k, k),
        })
    return params


# ----------------------------------------------------------------------------
# Demo
# ----------------------------------------------------------------------------

if __name__ == "__main__":
    B, T, EMB, LAYERS = 2, 8, 32, 2            # batch=2, seq=8, emb_size=32, n_layers=2

    key = jax.random.PRNGKey(0)
    kp, kx = jax.random.split(key)
    params = init_lstm_params(kp, EMB, LAYERS)
    x = jax.random.normal(kx, (B, T, EMB), jnp.float32)

    fwd = jax.jit(lstm_last_hidden)
    out = jax.block_until_ready(fwd(x, params))

    ref = lstm_ref(x, params)

    assert out.shape == (B, EMB), out.shape
    assert bool(jnp.all(jnp.isfinite(out)))
    # Matmul operands are bf16 (f32 accumulation); cell state / gate pre-activations stay f32,
    # so the result tracks the f32 reference within inference tolerance.
    max_err = float(jnp.max(jnp.abs(out - ref)))
    assert bool(jnp.allclose(out, ref, rtol=5e-2, atol=5e-2)), f"max abs err {max_err}"

    print("KERNEL_OK")
</pallas_src>

<mosaic_0001>
module attributes {stable_mosaic.version = 11 : i64} {
  func.func @_lstm_layer_kernel(%arg0: i32, %arg1: i32, %arg2: memref<1x64x128xbf16, #tpu.memory_space<vmem>>, %arg3: memref<1x128x512xbf16, #tpu.memory_space<vmem>>, %arg4: memref<1x128x512xbf16, #tpu.memory_space<vmem>>, %arg5: memref<1x1x512xf32, #tpu.memory_space<vmem>>, %arg6: memref<1x8x128xf32, #tpu.memory_space<vmem>>, %arg7: memref<64x128xbf16, #tpu.memory_space<vmem>>, %arg8: memref<64x512xf32, #tpu.memory_space<vmem>>) attributes {dimension_semantics = [#tpu.dimension_semantics<parallel>, #tpu.dimension_semantics<arbitrary>], iteration_bounds = array<i64: 1, 2>, scalar_prefetch = 0 : i64, scratch_operands = 2 : i64, tpu.core_type = #tpu.core_type<tc>, window_params = [{transform_indices = @transform_0, window_bounds = array<i64: 1, 64, 128>}, {transform_indices = @transform_1, window_bounds = array<i64: 1, 128, 512>}, {transform_indices = @transform_2, window_bounds = array<i64: 1, 128, 512>}, {transform_indices = @transform_3, window_bounds = array<i64: 1, 1, 512>}, {transform_indices = @transform_4, window_bounds = array<i64: 1, 8, 128>}]} {
    %c0 = arith.constant 0 : index
    %c0_0 = arith.constant 0 : index
    %c0_1 = arith.constant 0 : index
    %0 = vector.load %arg3[%c0, %c0_0, %c0_1] : memref<1x128x512xbf16, #tpu.memory_space<vmem>>, vector<1x128x512xbf16>
    %1 = vector.shape_cast %0 : vector<1x128x512xbf16> to vector<128x512xbf16>
    %c0_2 = arith.constant 0 : index
    %c0_3 = arith.constant 0 : index
    %c0_4 = arith.constant 0 : index
    %2 = vector.load %arg4[%c0_2, %c0_3, %c0_4] : memref<1x128x512xbf16, #tpu.memory_space<vmem>>, vector<1x128x512xbf16>
    %3 = vector.shape_cast %2 : vector<1x128x512xbf16> to vector<128x512xbf16>
    %c0_5 = arith.constant 0 : index
    %c0_6 = arith.constant 0 : index
    %c0_7 = arith.constant 0 : index
    %4 = vector.load %arg5[%c0_5, %c0_6, %c0_7] : memref<1x1x512xf32, #tpu.memory_space<vmem>>, vector<1x1x512xf32>
    %5 = vector.shape_cast %4 : vector<1x1x512xf32> to vector<1x512xf32>
    %c0_i32 = arith.constant 0 : i32
    %6 = arith.cmpi eq, %arg1, %c0_i32 : i32
    %7 = arith.extui %6 : i1 to i32
    %c0_i32_8 = arith.constant 0 : i32
    %8 = arith.cmpi ne, %7, %c0_i32_8 : i32
    scf.if %8 {
      %c0_70 = arith.constant 0 : index
      %c0_71 = arith.constant 0 : index
      %c0_72 = arith.constant 0 : index
      %296 = vector.load %arg2[%c0_70, %c0_71, %c0_72] : memref<1x64x128xbf16, #tpu.memory_space<vmem>>, vector<1x64x128xbf16>
      %297 = vector.shape_cast %296 : vector<1x64x128xbf16> to vector<64x128xbf16>
      %cst_73 = arith.constant dense<0.000000e+00> : vector<64x512xf32>
      %298 = tpu.matmul %297, %1, %cst_73 {dimension_numbers = #tpu.dot_dimension_numbers<[1], [0], [0], [1], [0, 0, 1, 1], [], []>} : vector<64x128xbf16>, vector<128x512xbf16>, vector<64x512xf32> -> vector<64x512xf32>
      %299 = vector.broadcast %5 : vector<1x512xf32> to vector<64x512xf32>
      %300 = arith.addf %298, %299 : vector<64x512xf32>
      %c0_74 = arith.constant 0 : index
      %c0_75 = arith.constant 0 : index
      %301 = vector.load %arg8[%c0_74, %c0_75] : memref<64x512xf32, #tpu.memory_space<vmem>>, vector<64x512xf32>
      tpu.vector_store %arg8[%c0_74, %c0_75], %300 {strides = array<i32>} : memref<64x512xf32, #tpu.memory_space<vmem>>, vector<64x512xf32>,
    } else {
    }
    %c0_i32_9 = arith.constant 0 : i32
    %9 = arith.cmpi sgt, %arg1, %c0_i32_9 : i32
    %10 = arith.extui %9 : i1 to i32
    %c0_i32_10 = arith.constant 0 : i32
    %11 = arith.cmpi ne, %10, %c0_i32_10 : i32
    scf.if %11 {
      %c0_70 = arith.constant 0 : index
      %c0_71 = arith.constant 0 : index
      %296 = vector.load %arg7[%c0_70, %c0_71] : memref<64x128xbf16, #tpu.memory_space<vmem>>, vector<64x128xbf16>
      %cst_72 = arith.constant dense<0.000000e+00> : vector<64x512xf32>
      %297 = tpu.matmul %296, %1, %cst_72 {dimension_numbers = #tpu.dot_dimension_numbers<[1], [0], [0], [1], [0, 0, 1, 1], [], []>} : vector<64x128xbf16>, vector<128x512xbf16>, vector<64x512xf32> -> vector<64x512xf32>
      %298 = vector.broadcast %5 : vector<1x512xf32> to vector<64x512xf32>
      %299 = arith.addf %297, %298 : vector<64x512xf32>
      %c0_73 = arith.constant 0 : index
      %c0_74 = arith.constant 0 : index
      %300 = vector.load %arg8[%c0_73, %c0_74] : memref<64x512xf32, #tpu.memory_space<vmem>>, vector<64x512xf32>
      tpu.vector_store %arg8[%c0_73, %c0_74], %299 {strides = array<i32>} : memref<64x512xf32, #tpu.memory_space<vmem>>, vector<64x512xf32>,
    } else {
    }
    %cst = arith.constant 0.000000e+00 : f32
    %12 = vector.broadcast %cst : f32 to vector<8x128xf32>
    %c0_i32_11 = arith.constant 0 : i32
    %c8_i32 = arith.constant 8 : i32
    %13 = arith.muli %c0_i32_11, %c8_i32 : i32
    %14 = tpu.assume_multiple %13, 8 : i32
    %15 = arith.index_cast %14 : i32 to index
    %c0_12 = arith.constant 0 : index
    %16 = vector.load %arg8[%15, %c0_12] : memref<64x512xf32, #tpu.memory_space<vmem>>, vector<8x512xf32>
    %17 = arith.truncf %12 : vector<8x128xf32> to vector<8x128xbf16>
    %cst_13 = arith.constant dense<0.000000e+00> : vector<8x512xf32>
    %18 = tpu.matmul %17, %3, %cst_13 {dimension_numbers = #tpu.dot_dimension_numbers<[1], [0], [0], [1], [0, 0, 1, 1], [], []>} : vector<8x128xbf16>, vector<128x512xbf16>, vector<8x512xf32> -> vector<8x512xf32>
    %19 = arith.addf %16, %18 : vector<8x512xf32>
    %20 = vector.extract_strided_slice %19 {offsets = [0, 0], sizes = [8, 128], strides = [1, 1]} : vector<8x512xf32> to vector<8x128xf32>
    %21 = arith.negf %20 : vector<8x128xf32>
    %22 = math.exp %21 : vector<8x128xf32>
    %cst_14 = arith.constant 1.000000e+00 : f32
    %23 = vector.broadcast %cst_14 : f32 to vector<8x128xf32>
    %24 = arith.addf %23, %22 : vector<8x128xf32>
    %25 = arith.divf %23, %24 : vector<8x128xf32>
    %26 = vector.extract_strided_slice %19 {offsets = [0, 128], sizes = [8, 128], strides = [1, 1]} : vector<8x512xf32> to vector<8x128xf32>
    %27 = arith.negf %26 : vector<8x128xf32>
    %28 = math.exp %27 : vector<8x128xf32>
    %cst_15 = arith.constant 1.000000e+00 : f32
    %29 = vector.broadcast %cst_15 : f32 to vector<8x128xf32>
    %30 = arith.addf %29, %28 : vector<8x128xf32>
    %31 = arith.divf %29, %30 : vector<8x128xf32>
    %32 = vector.extract_strided_slice %19 {offsets = [0, 256], sizes = [8, 128], strides = [1, 1]} : vector<8x512xf32> to vector<8x128xf32>
    %33 = math.tanh %32 : vector<8x128xf32>
    %34 = vector.extract_strided_slice %19 {offsets = [0, 384], sizes = [8, 128], strides = [1, 1]} : vector<8x512xf32> to vector<8x128xf32>
    %35 = arith.negf %34 : vector<8x128xf32>
    %36 = math.exp %35 : vector<8x128xf32>
    %cst_16 = arith.constant 1.000000e+00 : f32
    %37 = vector.broadcast %cst_16 : f32 to vector<8x128xf32>
    %38 = arith.addf %37, %36 : vector<8x128xf32>
    %39 = arith.divf %37, %38 : vector<8x128xf32>
    %40 = arith.mulf %31, %12 : vector<8x128xf32>
    %41 = arith.mulf %25, %33 : vector<8x128xf32>
    %42 = arith.addf %40, %41 : vector<8x128xf32>
    %43 = math.tanh %42 : vector<8x128xf32>
    %44 = arith.mulf %39, %43 : vector<8x128xf32>
    %45 = arith.truncf %44 : vector<8x128xf32> to vector<8x128xbf16>
    %46 = arith.index_cast %14 : i32 to index
    %c0_17 = arith.constant 0 : index
    %47 = vector.load %arg7[%46, %c0_17] : memref<64x128xbf16, #tpu.memory_space<vmem>>, vector<8x128xbf16>
    tpu.vector_store %arg7[%46, %c0_17], %45 {strides = array<i32>} : memref<64x128xbf16, #tpu.memory_space<vmem>>, vector<8x128xbf16>,
    %c1_i32 = arith.constant 1 : i32
    %c8_i32_18 = arith.constant 8 : i32
    %48 = arith.muli %c1_i32, %c8_i32_18 : i32
    %49 = tpu.assume_multiple %48, 8 : i32
    %50 = arith.index_cast %49 : i32 to index
    %c0_19 = arith.constant 0 : index
    %51 = vector.load %arg8[%50, %c0_19] : memref<64x512xf32, #tpu.memory_space<vmem>>, vector<8x512xf32>
    %52 = arith.truncf %44 : vector<8x128xf32> to vector<8x128xbf16>
    %cst_20 = arith.constant dense<0.000000e+00> : vector<8x512xf32>
    %53 = tpu.matmul %52, %3, %cst_20 {dimension_numbers = #tpu.dot_dimension_numbers<[1], [0], [0], [1], [0, 0, 1, 1], [], []>} : vector<8x128xbf16>, vector<128x512xbf16>, vector<8x512xf32> -> vector<8x512xf32>
    %54 = arith.addf %51, %53 : vector<8x512xf32>
    %55 = vector.extract_strided_slice %54 {offsets = [0, 0], sizes = [8, 128], strides = [1, 1]} : vector<8x512xf32> to vector<8x128xf32>
    %56 = arith.negf %55 : vector<8x128xf32>
    %57 = math.exp %56 : vector<8x128xf32>
    %cst_21 = arith.constant 1.000000e+00 : f32
    %58 = vector.broadcast %cst_21 : f32 to vector<8x128xf32>
    %59 = arith.addf %58, %57 : vector<8x128xf32>
    %60 = arith.divf %58, %59 : vector<8x128xf32>
    %61 = vector.extract_strided_slice %54 {offsets = [0, 128], sizes = [8, 128], strides = [1, 1]} : vector<8x512xf32> to vector<8x128xf32>
    %62 = arith.negf %61 : vector<8x128xf32>
    %63 = math.exp %62 : vector<8x128xf32>
    %cst_22 = arith.constant 1.000000e+00 : f32
    %64 = vector.broadcast %cst_22 : f32 to vector<8x128xf32>
    %65 = arith.addf %64, %63 : vector<8x128xf32>
    %66 = arith.divf %64, %65 : vector<8x128xf32>
    %67 = vector.extract_strided_slice %54 {offsets = [0, 256], sizes = [8, 128], strides = [1, 1]} : vector<8x512xf32> to vector<8x128xf32>
    %68 = math.tanh %67 : vector<8x128xf32>
    %69 = vector.extract_strided_slice %54 {offsets = [0, 384], sizes = [8, 128], strides = [1, 1]} : vector<8x512xf32> to vector<8x128xf32>
    %70 = arith.negf %69 : vector<8x128xf32>
    %71 = math.exp %70 : vector<8x128xf32>
    %cst_23 = arith.constant 1.000000e+00 : f32
    %72 = vector.broadcast %cst_23 : f32 to vector<8x128xf32>
    %73 = arith.addf %72, %71 : vector<8x128xf32>
    %74 = arith.divf %72, %73 : vector<8x128xf32>
    %75 = arith.mulf %66, %42 : vector<8x128xf32>
    %76 = arith.mulf %60, %68 : vector<8x128xf32>
    %77 = arith.addf %75, %76 : vector<8x128xf32>
    %78 = math.tanh %77 : vector<8x128xf32>
    %79 = arith.mulf %74, %78 : vector<8x128xf32>
    %80 = arith.truncf %79 : vector<8x128xf32> to vector<8x128xbf16>
    %81 = arith.index_cast %49 : i32 to index
    %c0_24 = arith.constant 0 : index
    %82 = vector.load %arg7[%81, %c0_24] : memref<64x128xbf16, #tpu.memory_space<vmem>>, vector<8x128xbf16>
    tpu.vector_store %arg7[%81, %c0_24], %80 {strides = array<i32>} : memref<64x128xbf16, #tpu.memory_space<vmem>>, vector<8x128xbf16>,
    %c2_i32 = arith.constant 2 : i32
    %c8_i32_25 = arith.constant 8 : i32
    %83 = arith.muli %c2_i32, %c8_i32_25 : i32
    %84 = tpu.assume_multiple %83, 8 : i32
    %85 = arith.index_cast %84 : i32 to index
    %c0_26 = arith.constant 0 : index
    %86 = vector.load %arg8[%85, %c0_26] : memref<64x512xf32, #tpu.memory_space<vmem>>, vector<8x512xf32>
    %87 = arith.truncf %79 : vector<8x128xf32> to vector<8x128xbf16>
    %cst_27 = arith.constant dense<0.000000e+00> : vector<8x512xf32>
    %88 = tpu.matmul %87, %3, %cst_27 {dimension_numbers = #tpu.dot_dimension_numbers<[1], [0], [0], [1], [0, 0, 1, 1], [], []>} : vector<8x128xbf16>, vector<128x512xbf16>, vector<8x512xf32> -> vector<8x512xf32>
    %89 = arith.addf %86, %88 : vector<8x512xf32>
    %90 = vector.extract_strided_slice %89 {offsets = [0, 0], sizes = [8, 128], strides = [1, 1]} : vector<8x512xf32> to vector<8x128xf32>
    %91 = arith.negf %90 : vector<8x128xf32>
    %92 = math.exp %91 : vector<8x128xf32>
    %cst_28 = arith.constant 1.000000e+00 : f32
    %93 = vector.broadcast %cst_28 : f32 to vector<8x128xf32>
    %94 = arith.addf %93, %92 : vector<8x128xf32>
    %95 = arith.divf %93, %94 : vector<8x128xf32>
    %96 = vector.extract_strided_slice %89 {offsets = [0, 128], sizes = [8, 128], strides = [1, 1]} : vector<8x512xf32> to vector<8x128xf32>
    %97 = arith.negf %96 : vector<8x128xf32>
    %98 = math.exp %97 : vector<8x128xf32>
    %cst_29 = arith.constant 1.000000e+00 : f32
    %99 = vector.broadcast %cst_29 : f32 to vector<8x128xf32>
    %100 = arith.addf %99, %98 : vector<8x128xf32>
    %101 = arith.divf %99, %100 : vector<8x128xf32>
    %102 = vector.extract_strided_slice %89 {offsets = [0, 256], sizes = [8, 128], strides = [1, 1]} : vector<8x512xf32> to vector<8x128xf32>
    %103 = math.tanh %102 : vector<8x128xf32>
    %104 = vector.extract_strided_slice %89 {offsets = [0, 384], sizes = [8, 128], strides = [1, 1]} : vector<8x512xf32> to vector<8x128xf32>
    %105 = arith.negf %104 : vector<8x128xf32>
    %106 = math.exp %105 : vector<8x128xf32>
    %cst_30 = arith.constant 1.000000e+00 : f32
    %107 = vector.broadcast %cst_30 : f32 to vector<8x128xf32>
    %108 = arith.addf %107, %106 : vector<8x128xf32>
    %109 = arith.divf %107, %108 : vector<8x128xf32>
    %110 = arith.mulf %101, %77 : vector<8x128xf32>
    %111 = arith.mulf %95, %103 : vector<8x128xf32>
    %112 = arith.addf %110, %111 : vector<8x128xf32>
    %113 = math.tanh %112 : vector<8x128xf32>
    %114 = arith.mulf %109, %113 : vector<8x128xf32>
    %115 = arith.truncf %114 : vector<8x128xf32> to vector<8x128xbf16>
    %116 = arith.index_cast %84 : i32 to index
    %c0_31 = arith.constant 0 : index
    %117 = vector.load %arg7[%116, %c0_31] : memref<64x128xbf16, #tpu.memory_space<vmem>>, vector<8x128xbf16>
    tpu.vector_store %arg7[%116, %c0_31], %115 {strides = array<i32>} : memref<64x128xbf16, #tpu.memory_space<vmem>>, vector<8x128xbf16>,
    %c3_i32 = arith.constant 3 : i32
    %c8_i32_32 = arith.constant 8 : i32
    %118 = arith.muli %c3_i32, %c8_i32_32 : i32
    %119 = tpu.assume_multiple %118, 8 : i32
    %120 = arith.index_cast %119 : i32 to index
    %c0_33 = arith.constant 0 : index
    %121 = vector.load %arg8[%120, %c0_33] : memref<64x512xf32, #tpu.memory_space<vmem>>, vector<8x512xf32>
    %122 = arith.truncf %114 : vector<8x128xf32> to vector<8x128xbf16>
    %cst_34 = arith.constant dense<0.000000e+00> : vector<8x512xf32>
    %123 = tpu.matmul %122, %3, %cst_34 {dimension_numbers = #tpu.dot_dimension_numbers<[1], [0], [0], [1], [0, 0, 1, 1], [], []>} : vector<8x128xbf16>, vector<128x512xbf16>, vector<8x512xf32> -> vector<8x512xf32>
    %124 = arith.addf %121, %123 : vector<8x512xf32>
    %125 = vector.extract_strided_slice %124 {offsets = [0, 0], sizes = [8, 128], strides = [1, 1]} : vector<8x512xf32> to vector<8x128xf32>
    %126 = arith.negf %125 : vector<8x128xf32>
    %127 = math.exp %126 : vector<8x128xf32>
    %cst_35 = arith.constant 1.000000e+00 : f32
    %128 = vector.broadcast %cst_35 : f32 to vector<8x128xf32>
    %129 = arith.addf %128, %127 : vector<8x128xf32>
    %130 = arith.divf %128, %129 : vector<8x128xf32>
    %131 = vector.extract_strided_slice %124 {offsets = [0, 128], sizes = [8, 128], strides = [1, 1]} : vector<8x512xf32> to vector<8x128xf32>
    %132 = arith.negf %131 : vector<8x128xf32>
    %133 = math.exp %132 : vector<8x128xf32>
    %cst_36 = arith.constant 1.000000e+00 : f32
    %134 = vector.broadcast %cst_36 : f32 to vector<8x128xf32>
    %135 = arith.addf %134, %133 : vector<8x128xf32>
    %136 = arith.divf %134, %135 : vector<8x128xf32>
    %137 = vector.extract_strided_slice %124 {offsets = [0, 256], sizes = [8, 128], strides = [1, 1]} : vector<8x512xf32> to vector<8x128xf32>
    %138 = math.tanh %137 : vector<8x128xf32>
    %139 = vector.extract_strided_slice %124 {offsets = [0, 384], sizes = [8, 128], strides = [1, 1]} : vector<8x512xf32> to vector<8x128xf32>
    %140 = arith.negf %139 : vector<8x128xf32>
    %141 = math.exp %140 : vector<8x128xf32>
    %cst_37 = arith.constant 1.000000e+00 : f32
    %142 = vector.broadcast %cst_37 : f32 to vector<8x128xf32>
    %143 = arith.addf %142, %141 : vector<8x128xf32>
    %144 = arith.divf %142, %143 : vector<8x128xf32>
    %145 = arith.mulf %136, %112 : vector<8x128xf32>
    %146 = arith.mulf %130, %138 : vector<8x128xf32>
    %147 = arith.addf %145, %146 : vector<8x128xf32>
    %148 = math.tanh %147 : vector<8x128xf32>
    %149 = arith.mulf %144, %148 : vector<8x128xf32>
    %150 = arith.truncf %149 : vector<8x128xf32> to vector<8x128xbf16>
    %151 = arith.index_cast %119 : i32 to index
    %c0_38 = arith.constant 0 : index
    %152 = vector.load %arg7[%151, %c0_38] : memref<64x128xbf16, #tpu.memory_space<vmem>>, vector<8x128xbf16>
    tpu.vector_store %arg7[%151, %c0_38], %150 {strides = array<i32>} : memref<64x128xbf16, #tpu.memory_space<vmem>>, vector<8x128xbf16>,
    %c4_i32 = arith.constant 4 : i32
    %c8_i32_39 = arith.constant 8 : i32
    %153 = arith.muli %c4_i32, %c8_i32_39 : i32
    %154 = tpu.assume_multiple %153, 8 : i32
    %155 = arith.index_cast %154 : i32 to index
    %c0_40 = arith.constant 0 : index
    %156 = vector.load %arg8[%155, %c0_40] : memref<64x512xf32, #tpu.memory_space<vmem>>, vector<8x512xf32>
    %157 = arith.truncf %149 : vector<8x128xf32> to vector<8x128xbf16>
    %cst_41 = arith.constant dense<0.000000e+00> : vector<8x512xf32>
    %158 = tpu.matmul %157, %3, %cst_41 {dimension_numbers = #tpu.dot_dimension_numbers<[1], [0], [0], [1], [0, 0, 1, 1], [], []>} : vector<8x128xbf16>, vector<128x512xbf16>, vector<8x512xf32> -> vector<8x512xf32>
    %159 = arith.addf %156, %158 : vector<8x512xf32>
    %160 = vector.extract_strided_slice %159 {offsets = [0, 0], sizes = [8, 128], strides = [1, 1]} : vector<8x512xf32> to vector<8x128xf32>
    %161 = arith.negf %160 : vector<8x128xf32>
    %162 = math.exp %161 : vector<8x128xf32>
    %cst_42 = arith.constant 1.000000e+00 : f32
    %163 = vector.broadcast %cst_42 : f32 to vector<8x128xf32>
    %164 = arith.addf %163, %162 : vector<8x128xf32>
    %165 = arith.divf %163, %164 : vector<8x128xf32>
    %166 = vector.extract_strided_slice %159 {offsets = [0, 128], sizes = [8, 128], strides = [1, 1]} : vector<8x512xf32> to vector<8x128xf32>
    %167 = arith.negf %166 : vector<8x128xf32>
    %168 = math.exp %167 : vector<8x128xf32>
    %cst_43 = arith.constant 1.000000e+00 : f32
    %169 = vector.broadcast %cst_43 : f32 to vector<8x128xf32>
    %170 = arith.addf %169, %168 : vector<8x128xf32>
    %171 = arith.divf %169, %170 : vector<8x128xf32>
    %172 = vector.extract_strided_slice %159 {offsets = [0, 256], sizes = [8, 128], strides = [1, 1]} : vector<8x512xf32> to vector<8x128xf32>
    %173 = math.tanh %172 : vector<8x128xf32>
    %174 = vector.extract_strided_slice %159 {offsets = [0, 384], sizes = [8, 128], strides = [1, 1]} : vector<8x512xf32> to vector<8x128xf32>
    %175 = arith.negf %174 : vector<8x128xf32>
    %176 = math.exp %175 : vector<8x128xf32>
    %cst_44 = arith.constant 1.000000e+00 : f32
    %177 = vector.broadcast %cst_44 : f32 to vector<8x128xf32>
    %178 = arith.addf %177, %176 : vector<8x128xf32>
    %179 = arith.divf %177, %178 : vector<8x128xf32>
    %180 = arith.mulf %171, %147 : vector<8x128xf32>
    %181 = arith.mulf %165, %173 : vector<8x128xf32>
    %182 = arith.addf %180, %181 : vector<8x128xf32>
    %183 = math.tanh %182 : vector<8x128xf32>
    %184 = arith.mulf %179, %183 : vector<8x128xf32>
    %185 = arith.truncf %184 : vector<8x128xf32> to vector<8x128xbf16>
    %186 = arith.index_cast %154 : i32 to index
    %c0_45 = arith.constant 0 : index
    %187 = vector.load %arg7[%186, %c0_45] : memref<64x128xbf16, #tpu.memory_space<vmem>>, vector<8x128xbf16>
    tpu.vector_store %arg7[%186, %c0_45], %185 {strides = array<i32>} : memref<64x128xbf16, #tpu.memory_space<vmem>>, vector<8x128xbf16>,
    %c5_i32 = arith.constant 5 : i32
    %c8_i32_46 = arith.constant 8 : i32
    %188 = arith.muli %c5_i32, %c8_i32_46 : i32
    %189 = tpu.assume_multiple %188, 8 : i32
    %190 = arith.index_cast %189 : i32 to index
    %c0_47 = arith.constant 0 : index
    %191 = vector.load %arg8[%190, %c0_47] : memref<64x512xf32, #tpu.memory_space<vmem>>, vector<8x512xf32>
    %192 = arith.truncf %184 : vector<8x128xf32> to vector<8x128xbf16>
    %cst_48 = arith.constant dense<0.000000e+00> : vector<8x512xf32>
    %193 = tpu.matmul %192, %3, %cst_48 {dimension_numbers = #tpu.dot_dimension_numbers<[1], [0], [0], [1], [0, 0, 1, 1], [], []>} : vector<8x128xbf16>, vector<128x512xbf16>, vector<8x512xf32> -> vector<8x512xf32>
    %194 = arith.addf %191, %193 : vector<8x512xf32>
    %195 = vector.extract_strided_slice %194 {offsets = [0, 0], sizes = [8, 128], strides = [1, 1]} : vector<8x512xf32> to vector<8x128xf32>
    %196 = arith.negf %195 : vector<8x128xf32>
    %197 = math.exp %196 : vector<8x128xf32>
    %cst_49 = arith.constant 1.000000e+00 : f32
    %198 = vector.broadcast %cst_49 : f32 to vector<8x128xf32>
    %199 = arith.addf %198, %197 : vector<8x128xf32>
    %200 = arith.divf %198, %199 : vector<8x128xf32>
    %201 = vector.extract_strided_slice %194 {offsets = [0, 128], sizes = [8, 128], strides = [1, 1]} : vector<8x512xf32> to vector<8x128xf32>
    %202 = arith.negf %201 : vector<8x128xf32>
    %203 = math.exp %202 : vector<8x128xf32>
    %cst_50 = arith.constant 1.000000e+00 : f32
    %204 = vector.broadcast %cst_50 : f32 to vector<8x128xf32>
    %205 = arith.addf %204, %203 : vector<8x128xf32>
    %206 = arith.divf %204, %205 : vector<8x128xf32>
    %207 = vector.extract_strided_slice %194 {offsets = [0, 256], sizes = [8, 128], strides = [1, 1]} : vector<8x512xf32> to vector<8x128xf32>
    %208 = math.tanh %207 : vector<8x128xf32>
    %209 = vector.extract_strided_slice %194 {offsets = [0, 384], sizes = [8, 128], strides = [1, 1]} : vector<8x512xf32> to vector<8x128xf32>
    %210 = arith.negf %209 : vector<8x128xf32>
    %211 = math.exp %210 : vector<8x128xf32>
    %cst_51 = arith.constant 1.000000e+00 : f32
    %212 = vector.broadcast %cst_51 : f32 to vector<8x128xf32>
    %213 = arith.addf %212, %211 : vector<8x128xf32>
    %214 = arith.divf %212, %213 : vector<8x128xf32>
    %215 = arith.mulf %206, %182 : vector<8x128xf32>
    %216 = arith.mulf %200, %208 : vector<8x128xf32>
    %217 = arith.addf %215, %216 : vector<8x128xf32>
    %218 = math.tanh %217 : vector<8x128xf32>
    %219 = arith.mulf %214, %218 : vector<8x128xf32>
    %220 = arith.truncf %219 : vector<8x128xf32> to vector<8x128xbf16>
    %221 = arith.index_cast %189 : i32 to index
    %c0_52 = arith.constant 0 : index
    %222 = vector.load %arg7[%221, %c0_52] : memref<64x128xbf16, #tpu.memory_space<vmem>>, vector<8x128xbf16>
    tpu.vector_store %arg7[%221, %c0_52], %220 {strides = array<i32>} : memref<64x128xbf16, #tpu.memory_space<vmem>>, vector<8x128xbf16>,
    %c6_i32 = arith.constant 6 : i32
    %c8_i32_53 = arith.constant 8 : i32
    %223 = arith.muli %c6_i32, %c8_i32_53 : i32
    %224 = tpu.assume_multiple %223, 8 : i32
    %225 = arith.index_cast %224 : i32 to index
    %c0_54 = arith.constant 0 : index
    %226 = vector.load %arg8[%225, %c0_54] : memref<64x512xf32, #tpu.memory_space<vmem>>, vector<8x512xf32>
    %227 = arith.truncf %219 : vector<8x128xf32> to vector<8x128xbf16>
    %cst_55 = arith.constant dense<0.000000e+00> : vector<8x512xf32>
    %228 = tpu.matmul %227, %3, %cst_55 {dimension_numbers = #tpu.dot_dimension_numbers<[1], [0], [0], [1], [0, 0, 1, 1], [], []>} : vector<8x128xbf16>, vector<128x512xbf16>, vector<8x512xf32> -> vector<8x512xf32>
    %229 = arith.addf %226, %228 : vector<8x512xf32>
    %230 = vector.extract_strided_slice %229 {offsets = [0, 0], sizes = [8, 128], strides = [1, 1]} : vector<8x512xf32> to vector<8x128xf32>
    %231 = arith.negf %230 : vector<8x128xf32>
    %232 = math.exp %231 : vector<8x128xf32>
    %cst_56 = arith.constant 1.000000e+00 : f32
    %233 = vector.broadcast %cst_56 : f32 to vector<8x128xf32>
    %234 = arith.addf %233, %232 : vector<8x128xf32>
    %235 = arith.divf %233, %234 : vector<8x128xf32>
    %236 = vector.extract_strided_slice %229 {offsets = [0, 128], sizes = [8, 128], strides = [1, 1]} : vector<8x512xf32> to vector<8x128xf32>
    %237 = arith.negf %236 : vector<8x128xf32>
    %238 = math.exp %237 : vector<8x128xf32>
    %cst_57 = arith.constant 1.000000e+00 : f32
    %239 = vector.broadcast %cst_57 : f32 to vector<8x128xf32>
    %240 = arith.addf %239, %238 : vector<8x128xf32>
    %241 = arith.divf %239, %240 : vector<8x128xf32>
    %242 = vector.extract_strided_slice %229 {offsets = [0, 256], sizes = [8, 128], strides = [1, 1]} : vector<8x512xf32> to vector<8x128xf32>
    %243 = math.tanh %242 : vector<8x128xf32>
    %244 = vector.extract_strided_slice %229 {offsets = [0, 384], sizes = [8, 128], strides = [1, 1]} : vector<8x512xf32> to vector<8x128xf32>
    %245 = arith.negf %244 : vector<8x128xf32>
    %246 = math.exp %245 : vector<8x128xf32>
    %cst_58 = arith.constant 1.000000e+00 : f32
    %247 = vector.broadcast %cst_58 : f32 to vector<8x128xf32>
    %248 = arith.addf %247, %246 : vector<8x128xf32>
    %249 = arith.divf %247, %248 : vector<8x128xf32>
    %250 = arith.mulf %241, %217 : vector<8x128xf32>
    %251 = arith.mulf %235, %243 : vector<8x128xf32>
    %252 = arith.addf %250, %251 : vector<8x128xf32>
    %253 = math.tanh %252 : vector<8x128xf32>
    %254 = arith.mulf %249, %253 : vector<8x128xf32>
    %255 = arith.truncf %254 : vector<8x128xf32> to vector<8x128xbf16>
    %256 = arith.index_cast %224 : i32 to index
    %c0_59 = arith.constant 0 : index
    %257 = vector.load %arg7[%256, %c0_59] : memref<64x128xbf16, #tpu.memory_space<vmem>>, vector<8x128xbf16>
    tpu.vector_store %arg7[%256, %c0_59], %255 {strides = array<i32>} : memref<64x128xbf16, #tpu.memory_space<vmem>>, vector<8x128xbf16>,
    %c7_i32 = arith.constant 7 : i32
    %c8_i32_60 = arith.constant 8 : i32
    %258 = arith.muli %c7_i32, %c8_i32_60 : i32
    %259 = tpu.assume_multiple %258, 8 : i32
    %260 = arith.index_cast %259 : i32 to index
    %c0_61 = arith.constant 0 : index
    %261 = vector.load %arg8[%260, %c0_61] : memref<64x512xf32, #tpu.memory_space<vmem>>, vector<8x512xf32>
    %262 = arith.truncf %254 : vector<8x128xf32> to vector<8x128xbf16>
    %cst_62 = arith.constant dense<0.000000e+00> : vector<8x512xf32>
    %263 = tpu.matmul %262, %3, %cst_62 {dimension_numbers = #tpu.dot_dimension_numbers<[1], [0], [0], [1], [0, 0, 1, 1], [], []>} : vector<8x128xbf16>, vector<128x512xbf16>, vector<8x512xf32> -> vector<8x512xf32>
    %264 = arith.addf %261, %263 : vector<8x512xf32>
    %265 = vector.extract_strided_slice %264 {offsets = [0, 0], sizes = [8, 128], strides = [1, 1]} : vector<8x512xf32> to vector<8x128xf32>
    %266 = arith.negf %265 : vector<8x128xf32>
    %267 = math.exp %266 : vector<8x128xf32>
    %cst_63 = arith.constant 1.000000e+00 : f32
    %268 = vector.broadcast %cst_63 : f32 to vector<8x128xf32>
    %269 = arith.addf %268, %267 : vector<8x128xf32>
    %270 = arith.divf %268, %269 : vector<8x128xf32>
    %271 = vector.extract_strided_slice %264 {offsets = [0, 128], sizes = [8, 128], strides = [1, 1]} : vector<8x512xf32> to vector<8x128xf32>
    %272 = arith.negf %271 : vector<8x128xf32>
    %273 = math.exp %272 : vector<8x128xf32>
    %cst_64 = arith.constant 1.000000e+00 : f32
    %274 = vector.broadcast %cst_64 : f32 to vector<8x128xf32>
    %275 = arith.addf %274, %273 : vector<8x128xf32>
    %276 = arith.divf %274, %275 : vector<8x128xf32>
    %277 = vector.extract_strided_slice %264 {offsets = [0, 256], sizes = [8, 128], strides = [1, 1]} : vector<8x512xf32> to vector<8x128xf32>
    %278 = math.tanh %277 : vector<8x128xf32>
    %279 = vector.extract_strided_slice %264 {offsets = [0, 384], sizes = [8, 128], strides = [1, 1]} : vector<8x512xf32> to vector<8x128xf32>
    %280 = arith.negf %279 : vector<8x128xf32>
    %281 = math.exp %280 : vector<8x128xf32>
    %cst_65 = arith.constant 1.000000e+00 : f32
    %282 = vector.broadcast %cst_65 : f32 to vector<8x128xf32>
    %283 = arith.addf %282, %281 : vector<8x128xf32>
    %284 = arith.divf %282, %283 : vector<8x128xf32>
    %285 = arith.mulf %276, %252 : vector<8x128xf32>
    %286 = arith.mulf %270, %278 : vector<8x128xf32>
    %287 = arith.addf %285, %286 : vector<8x128xf32>
    %288 = math.tanh %287 : vector<8x128xf32>
    %289 = arith.mulf %284, %288 : vector<8x128xf32>
    %290 = arith.truncf %289 : vector<8x128xf32> to vector<8x128xbf16>
    %291 = arith.index_cast %259 : i32 to index
    %c0_66 = arith.constant 0 : index
    %292 = vector.load %arg7[%291, %c0_66] : memref<64x128xbf16, #tpu.memory_space<vmem>>, vector<8x128xbf16>
    tpu.vector_store %arg7[%291, %c0_66], %290 {strides = array<i32>} : memref<64x128xbf16, #tpu.memory_space<vmem>>, vector<8x128xbf16>,
    %c8_i32_67 = arith.constant 8 : i32
    %c1_i32_68 = arith.constant 1 : i32
    %293 = arith.cmpi eq, %arg1, %c1_i32_68 : i32
    %294 = arith.extui %293 : i1 to i32
    %c0_i32_69 = arith.constant 0 : i32
    %295 = arith.cmpi ne, %294, %c0_i32_69 : i32
    scf.if %295 {
      %c0_70 = arith.constant 0 : index
      %c0_71 = arith.constant 0 : index
      %c0_72 = arith.constant 0 : index
      %296 = vector.load %arg6[%c0_70, %c0_71, %c0_72] : memref<1x8x128xf32, #tpu.memory_space<vmem>>, vector<1x8x128xf32>
      %297 = vector.shape_cast %296 : vector<1x8x128xf32> to vector<8x128xf32>
      %298 = vector.shape_cast %289 : vector<8x128xf32> to vector<1x8x128xf32>
      tpu.vector_store %arg6[%c0_70, %c0_71, %c0_72], %298 {strides = array<i32>} : memref<1x8x128xf32, #tpu.memory_space<vmem>>, vector<1x8x128xf32>,
    } else {
    }
    return
  }
  func.func @transform_0(%arg0: i32, %arg1: i32) -> (i32, i32, i32) {
    %c0_i32 = arith.constant 0 : i32
    %c0_i32_0 = arith.constant 0 : i32
    %c0_i32_1 = arith.constant 0 : i32
    return %arg0, %c0_i32, %c0_i32_0 : i32, i32, i32
  }
  func.func @transform_1(%arg0: i32, %arg1: i32) -> (i32, i32, i32) {
    %c0_i32 = arith.constant 0 : i32
    %c0_i32_0 = arith.constant 0 : i32
    %c0_i32_1 = arith.constant 0 : i32
    return %arg1, %c0_i32, %c0_i32_0 : i32, i32, i32
  }
  func.func @transform_2(%arg0: i32, %arg1: i32) -> (i32, i32, i32) {
    %c0_i32 = arith.constant 0 : i32
    %c0_i32_0 = arith.constant 0 : i32
    %c0_i32_1 = arith.constant 0 : i32
    return %arg1, %c0_i32, %c0_i32_0 : i32, i32, i32
  }
  func.func @transform_3(%arg0: i32, %arg1: i32) -> (i32, i32, i32) {
    %c0_i32 = arith.constant 0 : i32
    %c0_i32_0 = arith.constant 0 : i32
    %c0_i32_1 = arith.constant 0 : i32
    return %arg1, %c0_i32, %c0_i32_0 : i32, i32, i32
  }
  func.func @transform_4(%arg0: i32, %arg1: i32) -> (i32, i32, i32) {
    %c0_i32 = arith.constant 0 : i32
    %c0_i32_0 = arith.constant 0 : i32
    %c0_i32_1 = arith.constant 0 : i32
    return %arg0, %c0_i32, %c0_i32_0 : i32, i32, i32
  }
}

</mosaic_0001>

<bundles_post_ra>
// kernel: lstm_last_hidden.1
= control target key start
LH: loop header
LB: loop body
LE: loop exit
PB: predicated region body
PF: predicated region fallthrough
CT: control target
= control target key end

     0   :  { %s2711_s15 = smov 0   ;;  %s2713_s16 = smov 0   ;;  %s3629_s0 = inlined_call_operand.vmem [shape: bf16[1,64,128], index: 0, kind: input, shape index: {}]   ;;  %s3630_s1 = inlined_call_operand.vmem [shape: bf16[2,128,512], index: 1, kind: input, shape index: {}]   ;;  %s3631_s2 = inlined_call_operand.vmem [shape: bf16[2,128,512], index: 2, kind: input, shape index: {}]   ;;  %s3632_s3 = inlined_call_operand.vmem [shape: f32[2,1,512], index: 3, kind: input, shape index: {}]   ;;  %s3633_s4 = inlined_call_operand.vmem [shape: f32[1,8,128], index: 4, kind: output, shape index: {}]  }
   0x1   :  { %s2715_s17 = smov 0  }
   0x2 LB: > { %s23_s18 = sadd.s32 1, %s2677_s16  ;;  %p2354_p0 = scmp.ge.s32.totalorder %s2681_s17, 1  ;;  %s2681_s17 = sphi %s2715_s17, %s14_s17   ;;  %s2677_s16 = sphi %s2713_s16, %s3689_s16   ;;  %s2673_s15 = sphi %s2711_s15, %s3688_s15  }
   0x3   : > { %p24_p1 = scmp.ge.s32.totalorder %s23_s18, 2  ;;  %p203_p2 = scmp.lt.s32.totalorder %s2681_s17, 3 }
   0x5   : > { %s3691_s18 = smov (%p24_p1, %s23_s18), 0  ;;  %p204_p3 = pnand %p2354_p0, %p203_p2 }
   0x7   : > { %207 = sbr.rel (%p204_p3) target bundleno = 2614 (0xa36), region = 36 }
   0xc   : > { %p247_p4 = scmp.lt.s32.totalorder %s2673_s15, 1  ;;  %p2360_p5 = scmp.ne.s32.totalorder %s2673_s15, 0 }
   0xe   : > { %s2733_s19 = scalar_select %p247_p4, %s2673_s15, 1 }
  0x10   : > { %s2494_s20 = sshll.u32 %s2733_s19, 8  ;;  %s2359_s27 = sshll.u32 %s2733_s19, 2 }
  0x11   : > { %s2739_s23 = scalar_lea.vmem %s3630_s1, %s2494_s20  ;;  %s2807_s26 = scalar_lea.vmem %s3631_s2, %s2494_s20 }
  0x12   : > { %v2742_v0 = vld [vmem:[%s2739_s23] sm:$0xff]  ;;  %v2745_v1 = vld [vmem:[%s2739_s23 + $0x8] sm:$0xff]  ;;  %v2748_v2 = vld [vmem:[%s2739_s23 + $0x10] sm:$0xff]  ;;  %s260_s30 = scalar_lea.vmem %s3632_s3, %s2359_s27 }
  0x13   : > { %v2751_v3 = vld [vmem:[%s2739_s23 + $0x18] sm:$0xff]  ;;  %v2754_v4 = vld [vmem:[%s2739_s23 + $0x20] sm:$0xff]  ;;  %v2757_v5 = vld [vmem:[%s2739_s23 + $0x28] sm:$0xff] }
  0x14   : > { %v2760_v6 = vld [vmem:[%s2739_s23 + $0x30] sm:$0xff]  ;;  %v2763_v7 = vld [vmem:[%s2739_s23 + $0x38] sm:$0xff]  ;;  %v2766_v8 = vld [vmem:[%s2739_s23 + $0x40] sm:$0xff] }
  0x15   : > { %v2769_v9 = vld [vmem:[%s2739_s23 + $0x48] sm:$0xff]  ;;  %v2772_v10 = vld [vmem:[%s2739_s23 + $0x50] sm:$0xff]  ;;  %v2775_v11 = vld [vmem:[%s2739_s23 + $0x58] sm:$0xff] }
  0x16   : > { %v2778_v12 = vld [vmem:[%s2739_s23 + $0x60] sm:$0xff]  ;;  %v2781_v13 = vld [vmem:[%s2739_s23 + $0x68] sm:$0xff]  ;;  %v2784_v14 = vld [vmem:[%s2739_s23 + $0x70] sm:$0xff] }
  0x17   : > { %v2787_v15 = vld [vmem:[%s2739_s23 + $0x78] sm:$0xff]  ;;  %v2790_v16 = vld [vmem:[%s2739_s23 + $0x80] sm:$0xff]  ;;  %v2793_v17 = vld [vmem:[%s2739_s23 + $0x88] sm:$0xff] }
  0x18   : > { %v2796_v18 = vld [vmem:[%s2739_s23 + $0x90] sm:$0xff]  ;;  %v2799_v19 = vld [vmem:[%s2739_s23 + $0x98] sm:$0xff]  ;;  %v2802_v20 = vld [vmem:[%s2739_s23 + $0xa0] sm:$0xff] }
  0x19   : > { %v2810_v21 = vld [vmem:[%s2739_s23 + $0xa8] sm:$0xff]  ;;  %v2813_v22 = vld [vmem:[%s2739_s23 + $0xb0] sm:$0xff]  ;;  %v2816_v23 = vld [vmem:[%s2739_s23 + $0xb8] sm:$0xff] }
  0x1a   : > { %v2819_v24 = vld [vmem:[%s2739_s23 + $0xc0] sm:$0xff]  ;;  %v2822_v25 = vld [vmem:[%s2739_s23 + $0xc8] sm:$0xff]  ;;  %v2825_v26 = vld [vmem:[%s2739_s23 + $0xd0] sm:$0xff] }
  0x1b   : > { %v2828_v27 = vld [vmem:[%s2739_s23 + $0xd8] sm:$0xff]  ;;  %v2831_v28 = vld [vmem:[%s2739_s23 + $0xe0] sm:$0xff]  ;;  %v2834_v29 = vld [vmem:[%s2739_s23 + $0xe8] sm:$0xff] }
  0x1c   : > { %v2837_v30 = vld [vmem:[%s2739_s23 + $0xf0] sm:$0xff]  ;;  %v2840_v31 = vld [vmem:[%s2739_s23 + $0xf8] sm:$0xff]  ;;  %v2843_v32 = vld [vmem:[%s2807_s26] sm:$0xff] }
  0x1d   : > { %3652 = vst [vmem:[#allocation4_spill] sm:$0xff] %v2843_v32  ;;  %v2846_v33 = vld [vmem:[%s2807_s26 + $0x8] sm:$0xff]  ;;  %v2849_v34 = vld [vmem:[%s2807_s26 + $0x10] sm:$0xff]  ;;  %v2852_v35 = vld [vmem:[%s2807_s26 + $0x18] sm:$0xff] }
  0x1e   : > { %3653 = vst [vmem:[#allocation5_spill] sm:$0xff] %v2846_v33  ;;  %3654 = vst [vmem:[#allocation6_spill] sm:$0xff] %v2849_v34  ;;  %v2855_v36 = vld [vmem:[%s2807_s26 + $0x20] sm:$0xff]  ;;  %v2858_v37 = vld [vmem:[%s2807_s26 + $0x28] sm:$0xff] }
  0x1f   : > { %3655 = vst [vmem:[#allocation7_spill] sm:$0xff] %v2852_v35  ;;  %3656 = vst [vmem:[#allocation8_spill] sm:$0xff] %v2855_v36  ;;  %v2861_v38 = vld [vmem:[%s2807_s26 + $0x30] sm:$0xff]  ;;  %v2864_v39 = vld [vmem:[%s2807_s26 + $0x38] sm:$0xff] }
  0x20   : > { %3657 = vst [vmem:[#allocation9_spill] sm:$0xff] %v2858_v37  ;;  %3658 = vst [vmem:[#allocation10_spill] sm:$0xff] %v2861_v38  ;;  %v2867_v40 = vld [vmem:[%s2807_s26 + $0x40] sm:$0xff]  ;;  %v2870_v41 = vld [vmem:[%s2807_s26 + $0x48] sm:$0xff] }
  0x21   : > { %3659 = vst [vmem:[#allocation11_spill] sm:$0xff] %v2864_v39  ;;  %3660 = vst [vmem:[#allocation12_spill] sm:$0xff] %v2867_v40  ;;  %v2873_v42 = vld [vmem:[%s2807_s26 + $0x50] sm:$0xff]  ;;  %v2876_v43 = vld [vmem:[%s2807_s26 + $0x58] sm:$0xff] }
  0x22   : > { %3661 = vst [vmem:[#allocation13_spill] sm:$0xff] %v2870_v41  ;;  %3662 = vst [vmem:[#allocation14_spill] sm:$0xff] %v2873_v42  ;;  %v2879_v44 = vld [vmem:[%s2807_s26 + $0x60] sm:$0xff]  ;;  %v2883_v45 = vld [vmem:[%s2807_s26 + $0x68] sm:$0xff] }
  0x23   : > { %3663 = vst [vmem:[#allocation15_spill] sm:$0xff] %v2876_v43  ;;  %3664 = vst [vmem:[#allocation16_spill] sm:$0xff] %v2879_v44  ;;  %v2886_v46 = vld [vmem:[%s2807_s26 + $0x70] sm:$0xff]  ;;  %v2889_v47 = vld [vmem:[%s2807_s26 + $0x78] sm:$0xff] }
  0x24   : > { %3665 = vst [vmem:[#allocation17_spill] sm:$0xff] %v2883_v45  ;;  %3666 = vst [vmem:[#allocation18_spill] sm:$0xff] %v2886_v46  ;;  %v2892_v48 = vld [vmem:[%s2807_s26 + $0x80] sm:$0xff]  ;;  %v2895_v49 = vld [vmem:[%s2807_s26 + $0x88] sm:$0xff] }
  0x25   : > { %3667 = vst [vmem:[#allocation19_spill] sm:$0xff] %v2889_v47  ;;  %3668 = vst [vmem:[#allocation20_spill] sm:$0xff] %v2895_v49  ;;  %v2898_v50 = vld [vmem:[%s2807_s26 + $0x90] sm:$0xff]  ;;  %v2901_v51 = vld [vmem:[%s2807_s26 + $0x98] sm:$0xff] }
  0x26   : > { %3669 = vst [vmem:[#allocation21_spill] sm:$0xff] %v2901_v51  ;;  %v2904_v52 = vld [vmem:[%s2807_s26 + $0xa0] sm:$0xff]  ;;  %v2907_v53 = vld [vmem:[%s2807_s26 + $0xa8] sm:$0xff]  ;;  %v2913_v54 = vld [vmem:[%s2807_s26 + $0xb0] sm:$0xff]  ;;  %334 = sbr.rel (%p2360_p5) target bundleno = 303 (0x12f), region = 40 }
  0x27   : > { %v2916_v55 = vld [vmem:[%s2807_s26 + $0xb8] sm:$0xff]  ;;  %v2919_v56 = vld [vmem:[%s2807_s26 + $0xc0] sm:$0xff]  ;;  %v2922_v57 = vld [vmem:[%s2807_s26 + $0xc8] sm:$0xff] }
  0x28   : > { %v2925_v58 = vld [vmem:[%s2807_s26 + $0xd0] sm:$0xff]  ;;  %v2928_v59 = vld [vmem:[%s2807_s26 + $0xd8] sm:$0xff]  ;;  %v2931_v60 = vld [vmem:[%s2807_s26 + $0xe0] sm:$0xff] }
  0x29   : > { %v2934_v61 = vld [vmem:[%s2807_s26 + $0xe8] sm:$0xff]  ;;  %v2937_v62 = vld [vmem:[%s2807_s26 + $0xf0] sm:$0xff]  ;;  %v2940_v63 = vld [vmem:[%s2807_s26 + $0xf8] sm:$0xff] }
  0x2a   : > { %v2942_v33 = vld [vmem:[%s260_s30] sm:$0xf] }
  0x2b   : > { %v2394_v35 = vcombine.high %v2831_v28, %v2837_v30  ;;  %v2396_v32 = vcombine.high %v2834_v29, %v2840_v31  ;;  %v2393_v34 = vcombine.low %v2831_v28, %v2837_v30  ;;  %v2395_v37 = vcombine.low %v2834_v29, %v2840_v31 }
  0x2c   : > { %v2390_v39 = vcombine.high %v2819_v24, %v2825_v26  ;;  %v2392_v36 = vcombine.high %v2822_v25, %v2828_v27  ;;  %v2389_v38 = vcombine.low %v2819_v24, %v2825_v26  ;;  %v2391_v41 = vcombine.low %v2822_v25, %v2828_v27 }
  0x2d   : > { %548 = vmatprep.subr.bf16.mxu0 %v2394_v35  ;;  %621 = vmatprep.subr.bf16.mxu1 %v2396_v32  ;;  %v2386_v43 = vcombine.high %v2802_v20, %v2813_v22  ;;  %v2388_v40 = vcombine.high %v2810_v21, %v2816_v23  ;;  %v2683_v42 = vmov 0   ;;  %v2385_v32 = vcombine.low %v2802_v20, %v2813_v22 }
  0x2e   : > { %549 = vmatpush1.bf16.msra.mxu0 %v2393_v34  ;;  %622 = vmatpush1.bf16.msra.mxu1 %v2395_v37  ;;  %v2387_v34 = vcombine.low %v2810_v21, %v2816_v23  ;;  %v2382_v35 = vcombine.high %v2790_v16, %v2796_v18  ;;  %v2381_v37 = vcombine.low %v2790_v16, %v2796_v18 }
  0x2f   : > { %550 = vmatprep.subr.bf16.mxu0 %v2390_v39  ;;  %623 = vmatprep.subr.bf16.mxu1 %v2392_v36  ;;  %v2384_v36 = vcombine.high %v2793_v17, %v2799_v19  ;;  %v2378_v39 = vcombine.high %v2778_v12, %v2784_v14 }
  0x30   : > { %580 = vmatprep.mubr.bf16.mxu0 %v2683_v42  ;;  %653 = vmatprep.mubr.bf16.mxu1 %v2683_v42 }
  0x32   : > { %551 = vmatpush1.bf16.msra.mxu0 %v2389_v38  ;;  %624 = vmatpush1.bf16.msra.mxu1 %v2391_v41  ;;  %v2383_v38 = vcombine.low %v2793_v17, %v2799_v19  ;;  %v2377_v41 = vcombine.low %v2778_v12, %v2784_v14 }
  0x33   : > { %552 = vmatprep.subr.bf16.mxu0 %v2386_v43  ;;  %625 = vmatprep.subr.bf16.mxu1 %v2388_v40  ;;  %v2380_v40 = vcombine.high %v2781_v13, %v2787_v15  ;;  %v2379_v43 = vcombine.low %v2781_v13, %v2787_v15 }
  0x36   : > { %553 = vmatpush1.bf16.msra.mxu0 %v2385_v32  ;;  %626 = vmatpush1.bf16.msra.mxu1 %v2387_v34  ;;  %v2374_v32 = vcombine.high %v2766_v8, %v2772_v10  ;;  %v2376_v34 = vcombine.high %v2769_v9, %v2775_v11 }
  0x37   : > { %554 = vmatprep.subr.bf16.mxu0 %v2382_v35  ;;  %627 = vmatprep.subr.bf16.mxu1 %v2384_v36  ;;  %v2373_v35 = vcombine.low %v2766_v8, %v2772_v10  ;;  %v2375_v36 = vcombine.low %v2769_v9, %v2775_v11 }
  0x3a   : > { %555 = vmatpush1.bf16.msra.mxu0 %v2381_v37  ;;  %628 = vmatpush1.bf16.msra.mxu1 %v2383_v38  ;;  %v2370_v37 = vcombine.high %v2754_v4, %v2760_v6  ;;  %v2372_v38 = vcombine.high %v2757_v5, %v2763_v7 }
  0x3b   : > { %556 = vmatprep.subr.bf16.mxu0 %v2378_v39  ;;  %629 = vmatprep.subr.bf16.mxu1 %v2380_v40  ;;  %v2369_v39 = vcombine.low %v2754_v4, %v2760_v6  ;;  %v2371_v40 = vcombine.low %v2757_v5, %v2763_v7 }
  0x3e   : > { %557 = vmatpush1.bf16.msra.mxu0 %v2377_v41  ;;  %630 = vmatpush1.bf16.msra.mxu1 %v2379_v43  ;;  %v2366_v41 = vcombine.high %v2742_v0, %v2748_v2  ;;  %v2368_v43 = vcombine.high %v2745_v1, %v2751_v3 }
  0x3f   : > { %558 = vmatprep.subr.bf16.mxu0 %v2374_v32  ;;  %631 = vmatprep.subr.bf16.mxu1 %v2376_v34  ;;  %v2365_v32 = vcombine.low %v2742_v0, %v2748_v2  ;;  %v2367_v34 = vcombine.low %v2745_v1, %v2751_v3 }
  0x42   : > { %559 = vmatpush1.bf16.msra.mxu0 %v2373_v35  ;;  %632 = vmatpush1.bf16.msra.mxu1 %v2375_v36  ;;  %v2523_v35 = vld [vmem:[%s3629_s0] sm:$0xff]   ;;  %v2524_v36 = vld [vmem:[%s3629_s0 + $0x8] sm:$0xff]  }
  0x43   : > { %560 = vmatprep.subr.bf16.mxu0 %v2370_v37  ;;  %633 = vmatprep.subr.bf16.mxu1 %v2372_v38  ;;  %v2525_v37 = vld [vmem:[%s3629_s0 + $0x10] sm:$0xff]   ;;  %v2526_v38 = vld [vmem:[%s3629_s0 + $0x18] sm:$0xff]  }
  0x46   : > { %561 = vmatpush1.bf16.msra.mxu0 %v2369_v39  ;;  %634 = vmatpush1.bf16.msra.mxu1 %v2371_v40  ;;  %v344_v39 = vlaneseq }
  0x47   : > { %562 = vmatprep.subr.bf16.mxu0 %v2366_v41  ;;  %635 = vmatprep.subr.bf16.mxu1 %v2368_v43 }
  0x48   : > { %v345_v40 = vshrl.u32 %v344_v39, 7 }
  0x4a   : > { %563 = vmatpush1.bf16.msra.mxu0 %v2365_v32  ;;  %636 = vmatpush1.bf16.msra.mxu1 %v2367_v34  ;;  %v346_v41 = vsub.s32 0, %v345_v40  ;;  %v354_v43 = vsub.s32 2, %v345_v40  ;;  %v350_v32 = vsub.s32 1, %v345_v40  ;;  %v358_v34 = vsub.s32 3, %v345_v40 }
  0x4d   : > { %581 = vmatmul.mubr.bf16.vlgmr.msra.gmra.mxu0 %v2523_v35  ;;  %654 = vmatmul.mubr.bf16.vlgmr.msra.gmra.mxu1 %v2523_v35  ;;  %v3030_v35 = vrot.slane %v2942_v33, %v346_v41 }
  0x4e   : > { %590 = vmatprep.mubr.bf16.mxu0 %v2683_v42  ;;  %663 = vmatprep.mubr.bf16.mxu1 %v2683_v42 }
  0x55   : > { %591 = vmatmul.mubr.bf16.gmra.mxu0 %v2524_v36  ;;  %664 = vmatmul.mubr.bf16.gmra.mxu1 %v2524_v36  ;;  %v3033_v36 = vrot.slane %v2942_v33, %v354_v43 }
  0x56   : > { %600 = vmatprep.mubr.bf16.mxu0 %v2683_v42  ;;  %673 = vmatprep.mubr.bf16.mxu1 %v2683_v42 }
  0x5d   : > { %601 = vmatmul.mubr.bf16.gmra.mxu0 %v2525_v37  ;;  %674 = vmatmul.mubr.bf16.gmra.mxu1 %v2525_v37  ;;  %v3039_v37 = vrot.slane %v2942_v33, %v358_v34 }
  0x5e   : > { %610 = vmatprep.mubr.bf16.mxu0 %v2683_v42  ;;  %683 = vmatprep.mubr.bf16.mxu1 %v2683_v42  ;;  %v3036_v42 = vrot.slane %v2942_v33, %v350_v32 }
  0x65   : > { %611 = vmatmul.mubr.bf16.gmra.mxu0 %v2526_v38  ;;  %684 = vmatmul.mubr.bf16.gmra.mxu1 %v2526_v38 }
 0x10d   : > { %v582_v45 = vpop.f32.mrf.mxu0  ;;  %v655_v38 = vpop.f32.mrf.mxu1 }
 0x10e   : > { %v583_v39 = vadd.f32 %v582_v45, %v3030_v35  ;;  %v656_v47 = vadd.f32 %v655_v38, %v3033_v36 }
 0x10f   : > { %v584_v44 = vpop.f32.mrf.mxu0  ;;  %v657_v40 = vpop.f32.mrf.mxu1 }
 0x110   : > { %694 = vst [vmem:[#allocation3 + $0xb0] sm:$0xff] %v583_v39  ;;  %696 = vst [vmem:[#allocation3 + $0xd8] sm:$0xff] %v656_v47  ;;  %v585_v41 = vadd.f32 %v584_v44, %v3036_v42  ;;  %v658_v43 = vadd.f32 %v657_v40, %v3039_v37 }
 0x111   : > { %v586_v46 = vpop.f32.mrf.mxu0  ;;  %v659_v32 = vpop.f32.mrf.mxu1 }
 0x112   : > { %695 = vst [vmem:[#allocation3] sm:$0xff] %v585_v41  ;;  %697 = vst [vmem:[#allocation3 + $0x18] sm:$0xff] %v658_v43  ;;  %v587_v34 = vadd.f32 %v586_v46, %v3030_v35  ;;  %v660_v49 = vadd.f32 %v659_v32, %v3033_v36 }
 0x113   : > { %v588_v51 = vpop.f32.mrf.mxu0  ;;  %v661_v45 = vpop.f32.mrf.mxu1 }
 0x114   : > { %698 = vst [vmem:[#allocation3 + $0x50] sm:$0xff] %v587_v34  ;;  %700 = vst [vmem:[#allocation3 + $0x30] sm:$0xff] %v660_v49  ;;  %v589_v38 = vadd.f32 %v588_v51, %v3036_v42  ;;  %v662_v47 = vadd.f32 %v661_v45, %v3039_v37 }
 0x115   : > { %v592_v39 = vpop.f32.mrf.mxu0  ;;  %v665_v44 = vpop.f32.mrf.mxu1 }
 0x116   : > { %699 = vst [vmem:[#allocation3 + $0x68] sm:$0xff] %v589_v38  ;;  %701 = vst [vmem:[#allocation3 + $0x48] sm:$0xff] %v662_v47  ;;  %v593_v40 = vadd.f32 %v592_v39, %v3030_v35  ;;  %v666_v41 = vadd.f32 %v665_v44, %v3033_v36 }
 0x117   : > { %v594_v43 = vpop.f32.mrf.mxu0  ;;  %v667_v46 = vpop.f32.mrf.mxu1 }
 0x118   : > { %702 = vst [vmem:[#allocation3 + $0x80] sm:$0xff] %v593_v40  ;;  %704 = vst [vmem:[#allocation3 + $0xe8] sm:$0xff] %v666_v41  ;;  %v595_v32 = vadd.f32 %v594_v43, %v3036_v42  ;;  %v668_v49 = vadd.f32 %v667_v46, %v3039_v37 }
 0x119   : > { %v596_v34 = vpop.f32.mrf.mxu0  ;;  %v669_v51 = vpop.f32.mrf.mxu1 }
 0x11a   : > { %703 = vst [vmem:[#allocation3 + $0x88] sm:$0xff] %v595_v32  ;;  %705 = vst [vmem:[#allocation3 + $0xb8] sm:$0xff] %v668_v49  ;;  %v597_v45 = vadd.f32 %v596_v34, %v3030_v35  ;;  %v670_v38 = vadd.f32 %v669_v51, %v3033_v36 }
 0x11b   : > { %v598_v47 = vpop.f32.mrf.mxu0  ;;  %v671_v39 = vpop.f32.mrf.mxu1 }
 0x11c   : > { %706 = vst [vmem:[#allocation3 + $0x60] sm:$0xff] %v597_v45  ;;  %708 = vst [vmem:[#allocation3 + $0x8] sm:$0xff] %v670_v38  ;;  %v599_v44 = vadd.f32 %v598_v47, %v3036_v42  ;;  %v672_v40 = vadd.f32 %v671_v39, %v3039_v37 }
 0x11d   : > { %v602_v41 = vpop.f32.mrf.mxu0  ;;  %v675_v43 = vpop.f32.mrf.mxu1 }
 0x11e   : > { %707 = vst [vmem:[#allocation3 + $0xf0] sm:$0xff] %v599_v44  ;;  %709 = vst [vmem:[#allocation3 + $0x78] sm:$0xff] %v672_v40  ;;  %v603_v46 = vadd.f32 %v602_v41, %v3030_v35  ;;  %v676_v32 = vadd.f32 %v675_v43, %v3033_v36 }
 0x11f   : > { %v604_v49 = vpop.f32.mrf.mxu0  ;;  %v677_v34 = vpop.f32.mrf.mxu1 }
 0x120   : > { %710 = vst [vmem:[#allocation3 + $0x38] sm:$0xff] %v603_v46  ;;  %712 = vst [vmem:[#allocation3 + $0x40] sm:$0xff] %v676_v32  ;;  %v605_v51 = vadd.f32 %v604_v49, %v3036_v42  ;;  %v678_v45 = vadd.f32 %v677_v34, %v3039_v37 }
 0x121   : > { %v606_v38 = vpop.f32.mrf.mxu0  ;;  %v679_v47 = vpop.f32.mrf.mxu1 }
 0x122   : > { %711 = vst [vmem:[#allocation3 + $0x58] sm:$0xff] %v605_v51  ;;  %713 = vst [vmem:[#allocation3 + $0xc8] sm:$0xff] %v678_v45  ;;  %v607_v39 = vadd.f32 %v606_v38, %v3030_v35  ;;  %v680_v44 = vadd.f32 %v679_v47, %v3033_v36 }
 0x123   : > { %v608_v40 = vpop.f32.mrf.mxu0  ;;  %v681_v41 = vpop.f32.mrf.mxu1 }
 0x124   : > { %714 = vst [vmem:[#allocation3 + $0xe0] sm:$0xff] %v607_v39  ;;  %716 = vst [vmem:[#allocation3 + $0x70] sm:$0xff] %v680_v44  ;;  %v609_v43 = vadd.f32 %v608_v40, %v3036_v42  ;;  %v682_v46 = vadd.f32 %v681_v41, %v3039_v37 }
 0x125   : > { %v612_v32 = vpop.f32.mrf.mxu0  ;;  %v685_v49 = vpop.f32.mrf.mxu1 }
 0x126   : > { %715 = vst [vmem:[#allocation3 + $0x90] sm:$0xff] %v609_v43  ;;  %717 = vst [vmem:[#allocation3 + $0xc0] sm:$0xff] %v682_v46  ;;  %v613_v34 = vadd.f32 %v612_v32, %v3030_v35  ;;  %v686_v51 = vadd.f32 %v685_v49, %v3033_v36 }
 0x127   : > { %v614_v45 = vpop.f32.mrf.mxu0  ;;  %v687_v38 = vpop.f32.mrf.mxu1 }
 0x128   : > { %718 = vst [vmem:[#allocation3 + $0xa8] sm:$0xff] %v613_v34  ;;  %720 = vst [vmem:[#allocation3 + $0x10] sm:$0xff] %v686_v51  ;;  %v615_v47 = vadd.f32 %v614_v45, %v3036_v42  ;;  %v688_v39 = vadd.f32 %v687_v38, %v3039_v37 }
 0x129   : > { %v616_v44 = vpop.f32.mrf.mxu0  ;;  %v689_v40 = vpop.f32.mrf.mxu1 }
 0x12a   : > { %719 = vst [vmem:[#allocation3 + $0xd0] sm:$0xff] %v615_v47  ;;  %721 = vst [vmem:[#allocation3 + $0x28] sm:$0xff] %v688_v39  ;;  %v617_v41 = vadd.f32 %v616_v44, %v3030_v35  ;;  %v690_v43 = vadd.f32 %v689_v40, %v3033_v36 }
 0x12b   : > { %v618_v46 = vpop.f32.mrf.mxu0  ;;  %v691_v32 = vpop.f32.mrf.mxu1 }
 0x12c   : > { %722 = vst [vmem:[#allocation3 + $0xa0] sm:$0xff] %v617_v41  ;;  %724 = vst [vmem:[#allocation3 + $0x20] sm:$0xff] %v690_v43  ;;  %v619_v49 = vadd.f32 %v618_v46, %v3036_v42  ;;  %v692_v34 = vadd.f32 %v691_v32, %v3039_v37 }
 0x12e   : > { %723 = vst [vmem:[#allocation3 + $0xf8] sm:$0xff] %v619_v49  ;;  %725 = vst [vmem:[#allocation3 + $0x98] sm:$0xff] %v692_v34 }
 0x12f PF: > { %p2397_p6 = scmp.le.s32.totalorder %s2673_s15, 0 }
 0x131   : > { %729 = sbr.rel (%p2397_p6) target bundleno = 570 (0x23a), region = 44 }
 0x136   : > { %v2431_v51 = vcombine.high %v2831_v28, %v2837_v30  ;;  %v2433_v35 = vcombine.high %v2834_v29, %v2840_v31  ;;  %v2430_v36 = vcombine.low %v2831_v28, %v2837_v30  ;;  %v2432_v42 = vcombine.low %v2834_v29, %v2840_v31 }
 0x137   : > { %v2427_v37 = vcombine.high %v2819_v24, %v2825_v26  ;;  %v2429_v45 = vcombine.high %v2822_v25, %v2828_v27  ;;  %v2426_v38 = vcombine.low %v2819_v24, %v2825_v26  ;;  %v2428_v47 = vcombine.low %v2822_v25, %v2828_v27 }
 0x138   : > { %943 = vmatprep.subr.bf16.mxu0 %v2431_v51  ;;  %1016 = vmatprep.subr.bf16.mxu1 %v2433_v35  ;;  %v2423_v28 = vcombine.high %v2802_v20, %v2813_v22  ;;  %v2425_v29 = vcombine.high %v2810_v21, %v2816_v23  ;;  %v2684_v30 = vmov 0   ;;  %v2422_v24 = vcombine.low %v2802_v20, %v2813_v22 }
 0x139   : > { %944 = vmatpush1.bf16.msra.mxu0 %v2430_v36  ;;  %1017 = vmatpush1.bf16.msra.mxu1 %v2432_v42  ;;  %v2424_v25 = vcombine.low %v2810_v21, %v2816_v23  ;;  %v2419_v26 = vcombine.high %v2790_v16, %v2796_v18  ;;  %v2421_v27 = vcombine.high %v2793_v17, %v2799_v19 }
 0x13a   : > { %945 = vmatprep.subr.bf16.mxu0 %v2427_v37  ;;  %1018 = vmatprep.subr.bf16.mxu1 %v2429_v45  ;;  %v2418_v31 = vcombine.low %v2790_v16, %v2796_v18  ;;  %v2420_v39 = vcombine.low %v2793_v17, %v2799_v19  ;;  %v2415_v20 = vcombine.high %v2778_v12, %v2784_v14 }
 0x13b   : > { %975 = vmatprep.mubr.bf16.mxu0 %v2684_v30  ;;  %1048 = vmatprep.mubr.bf16.mxu1 %v2684_v30  ;;  %v2417_v21 = vcombine.high %v2781_v13, %v2787_v15  ;;  %v2414_v22 = vcombine.low %v2778_v12, %v2784_v14  ;;  %v2416_v23 = vcombine.low %v2781_v13, %v2787_v15 }
 0x13c   : > { %v2411_v16 = vcombine.high %v2766_v8, %v2772_v10  ;;  %v2413_v17 = vcombine.high %v2769_v9, %v2775_v11  ;;  %v2410_v18 = vcombine.low %v2766_v8, %v2772_v10  ;;  %v2412_v19 = vcombine.low %v2769_v9, %v2775_v11 }
 0x13d   : > { %946 = vmatpush1.bf16.msra.mxu0 %v2426_v38  ;;  %1019 = vmatpush1.bf16.msra.mxu1 %v2428_v47  ;;  %v2407_v12 = vcombine.high %v2754_v4, %v2760_v6  ;;  %v2409_v13 = vcombine.high %v2757_v5, %v2763_v7  ;;  %v2406_v14 = vcombine.low %v2754_v4, %v2760_v6  ;;  %v2527_v4 = vld [vmem:[#allocation2] sm:$0xff]  }
 0x13e   : > { %947 = vmatprep.subr.bf16.mxu0 %v2423_v28  ;;  %1020 = vmatprep.subr.bf16.mxu1 %v2425_v29  ;;  %v2408_v15 = vcombine.low %v2757_v5, %v2763_v7  ;;  %v2403_v8 = vcombine.high %v2742_v0, %v2748_v2  ;;  %v2405_v9 = vcombine.high %v2745_v1, %v2751_v3  ;;  %v2528_v5 = vld [vmem:[#allocation2 + $0x8] sm:$0xff]  }
 0x13f   : > { %v2402_v10 = vcombine.low %v2742_v0, %v2748_v2  ;;  %v2404_v11 = vcombine.low %v2745_v1, %v2751_v3  ;;  %v2529_v0 = vld [vmem:[#allocation2 + $0x10] sm:$0xff]   ;;  %v2530_v1 = vld [vmem:[#allocation2 + $0x18] sm:$0xff]   ;;  %v739_v2 = vlaneseq }
 0x141   : > { %948 = vmatpush1.bf16.msra.mxu0 %v2422_v24  ;;  %1021 = vmatpush1.bf16.msra.mxu1 %v2424_v25  ;;  %v740_v3 = vshrl.u32 %v739_v2, 7 }
 0x142   : > { %949 = vmatprep.subr.bf16.mxu0 %v2419_v26  ;;  %1022 = vmatprep.subr.bf16.mxu1 %v2421_v27 }
 0x143   : > { %v741_v6 = vsub.s32 0, %v740_v3  ;;  %v749_v7 = vsub.s32 2, %v740_v3  ;;  %v745_v44 = vsub.s32 1, %v740_v3  ;;  %v753_v40 = vsub.s32 3, %v740_v3 }
 0x145   : > { %950 = vmatpush1.bf16.msra.mxu0 %v2418_v31  ;;  %1023 = vmatpush1.bf16.msra.mxu1 %v2420_v39  ;;  %v3147_v41 = vrot.slane %v2942_v33, %v741_v6  ;;  %v3150_v43 = vrot.slane %v2942_v33, %v749_v7  ;;  %v3153_v46 = vrot.slane %v2942_v33, %v745_v44 }
 0x146   : > { %951 = vmatprep.subr.bf16.mxu0 %v2415_v20  ;;  %1024 = vmatprep.subr.bf16.mxu1 %v2417_v21  ;;  %v3156_v32 = vrot.slane %v2942_v33, %v753_v40 }
 0x149   : > { %952 = vmatpush1.bf16.msra.mxu0 %v2414_v22  ;;  %1025 = vmatpush1.bf16.msra.mxu1 %v2416_v23 }
 0x14a   : > { %953 = vmatprep.subr.bf16.mxu0 %v2411_v16  ;;  %1026 = vmatprep.subr.bf16.mxu1 %v2413_v17 }
 0x14d   : > { %954 = vmatpush1.bf16.msra.mxu0 %v2410_v18  ;;  %1027 = vmatpush1.bf16.msra.mxu1 %v2412_v19 }
 0x14e   : > { %955 = vmatprep.subr.bf16.mxu0 %v2407_v12  ;;  %1028 = vmatprep.subr.bf16.mxu1 %v2409_v13 }
 0x151   : > { %956 = vmatpush1.bf16.msra.mxu0 %v2406_v14  ;;  %1029 = vmatpush1.bf16.msra.mxu1 %v2408_v15 }
 0x152   : > { %957 = vmatprep.subr.bf16.mxu0 %v2403_v8  ;;  %1030 = vmatprep.subr.bf16.mxu1 %v2405_v9 }
 0x155   : > { %958 = vmatpush1.bf16.msra.mxu0 %v2402_v10  ;;  %1031 = vmatpush1.bf16.msra.mxu1 %v2404_v11 }
 0x158   : > { %976 = vmatmul.mubr.bf16.vlgmr.msra.gmra.mxu0 %v2527_v4  ;;  %1049 = vmatmul.mubr.bf16.vlgmr.msra.gmra.mxu1 %v2527_v4 }
 0x159   : > { %985 = vmatprep.mubr.bf16.mxu0 %v2684_v30  ;;  %1058 = vmatprep.mubr.bf16.mxu1 %v2684_v30 }
 0x160   : > { %986 = vmatmul.mubr.bf16.gmra.mxu0 %v2528_v5  ;;  %1059 = vmatmul.mubr.bf16.gmra.mxu1 %v2528_v5 }
 0x161   : > { %995 = vmatprep.mubr.bf16.mxu0 %v2684_v30  ;;  %1068 = vmatprep.mubr.bf16.mxu1 %v2684_v30 }
 0x168   : > { %996 = vmatmul.mubr.bf16.gmra.mxu0 %v2529_v0  ;;  %1069 = vmatmul.mubr.bf16.gmra.mxu1 %v2529_v0 }
 0x169   : > { %1005 = vmatprep.mubr.bf16.mxu0 %v2684_v30  ;;  %1078 = vmatprep.mubr.bf16.mxu1 %v2684_v30 }
 0x170   : > { %1006 = vmatmul.mubr.bf16.gmra.mxu0 %v2530_v1  ;;  %1079 = vmatmul.mubr.bf16.gmra.mxu1 %v2530_v1 }
 0x218   : > { %v977_v49 = vpop.f32.mrf.mxu0  ;;  %v1050_v34 = vpop.f32.mrf.mxu1 }
 0x219   : > { %v978_v51 = vadd.f32 %v977_v49, %v3147_v41  ;;  %v1051_v35 = vadd.f32 %v1050_v34, %v3150_v43 }
 0x21a   : > { %v979_v36 = vpop.f32.mrf.mxu0  ;;  %v1052_v42 = vpop.f32.mrf.mxu1 }
 0x21b   : > { %1089 = vst [vmem:[#allocation3 + $0xb0] sm:$0xff] %v978_v51  ;;  %1091 = vst [vmem:[#allocation3 + $0xd8] sm:$0xff] %v1051_v35  ;;  %v980_v37 = vadd.f32 %v979_v36, %v3153_v46  ;;  %v1053_v45 = vadd.f32 %v1052_v42, %v3156_v32 }
 0x21c   : > { %v981_v38 = vpop.f32.mrf.mxu0  ;;  %v1054_v47 = vpop.f32.mrf.mxu1 }
 0x21d   : > { %1090 = vst [vmem:[#allocation3] sm:$0xff] %v980_v37  ;;  %1092 = vst [vmem:[#allocation3 + $0x18] sm:$0xff] %v1053_v45  ;;  %v982_v33 = vadd.f32 %v981_v38, %v3147_v41  ;;  %v1055_v28 = vadd.f32 %v1054_v47, %v3150_v43 }
 0x21e   : > { %v983_v29 = vpop.f32.mrf.mxu0  ;;  %v1056_v30 = vpop.f32.mrf.mxu1 }
 0x21f   : > { %1093 = vst [vmem:[#allocation3 + $0x50] sm:$0xff] %v982_v33  ;;  %1095 = vst [vmem:[#allocation3 + $0x30] sm:$0xff] %v1055_v28  ;;  %v984_v24 = vadd.f32 %v983_v29, %v3153_v46  ;;  %v1057_v25 = vadd.f32 %v1056_v30, %v3156_v32 }
 0x220   : > { %v987_v26 = vpop.f32.mrf.mxu0  ;;  %v1060_v27 = vpop.f32.mrf.mxu1 }
 0x221   : > { %1094 = vst [vmem:[#allocation3 + $0x68] sm:$0xff] %v984_v24  ;;  %1096 = vst [vmem:[#allocation3 + $0x48] sm:$0xff] %v1057_v25  ;;  %v988_v31 = vadd.f32 %v987_v26, %v3147_v41  ;;  %v1061_v39 = vadd.f32 %v1060_v27, %v3150_v43 }
 0x222   : > { %v989_v20 = vpop.f32.mrf.mxu0  ;;  %v1062_v21 = vpop.f32.mrf.mxu1 }
 0x223   : > { %1097 = vst [vmem:[#allocation3 + $0x80] sm:$0xff] %v988_v31  ;;  %1099 = vst [vmem:[#allocation3 + $0xe8] sm:$0xff] %v1061_v39  ;;  %v990_v22 = vadd.f32 %v989_v20, %v3153_v46  ;;  %v1063_v23 = vadd.f32 %v1062_v21, %v3156_v32 }
 0x224   : > { %v991_v16 = vpop.f32.mrf.mxu0  ;;  %v1064_v17 = vpop.f32.mrf.mxu1 }
 0x225   : > { %1098 = vst [vmem:[#allocation3 + $0x88] sm:$0xff] %v990_v22  ;;  %1100 = vst [vmem:[#allocation3 + $0xb8] sm:$0xff] %v1063_v23  ;;  %v992_v18 = vadd.f32 %v991_v16, %v3147_v41  ;;  %v1065_v19 = vadd.f32 %v1064_v17, %v3150_v43 }
 0x226   : > { %v993_v12 = vpop.f32.mrf.mxu0  ;;  %v1066_v13 = vpop.f32.mrf.mxu1 }
 0x227   : > { %1101 = vst [vmem:[#allocation3 + $0x60] sm:$0xff] %v992_v18  ;;  %1103 = vst [vmem:[#allocation3 + $0x8] sm:$0xff] %v1065_v19  ;;  %v994_v14 = vadd.f32 %v993_v12, %v3153_v46  ;;  %v1067_v15 = vadd.f32 %v1066_v13, %v3156_v32 }
 0x228   : > { %v997_v8 = vpop.f32.mrf.mxu0  ;;  %v1070_v9 = vpop.f32.mrf.mxu1 }
 0x229   : > { %1102 = vst [vmem:[#allocation3 + $0xf0] sm:$0xff] %v994_v14  ;;  %1104 = vst [vmem:[#allocation3 + $0x78] sm:$0xff] %v1067_v15  ;;  %v998_v10 = vadd.f32 %v997_v8, %v3147_v41  ;;  %v1071_v11 = vadd.f32 %v1070_v9, %v3150_v43 }
 0x22a   : > { %v999_v4 = vpop.f32.mrf.mxu0  ;;  %v1072_v5 = vpop.f32.mrf.mxu1 }
 0x22b   : > { %1105 = vst [vmem:[#allocation3 + $0x38] sm:$0xff] %v998_v10  ;;  %1107 = vst [vmem:[#allocation3 + $0x40] sm:$0xff] %v1071_v11  ;;  %v1000_v0 = vadd.f32 %v999_v4, %v3153_v46  ;;  %v1073_v1 = vadd.f32 %v1072_v5, %v3156_v32 }
 0x22c   : > { %v1001_v2 = vpop.f32.mrf.mxu0  ;;  %v1074_v3 = vpop.f32.mrf.mxu1 }
 0x22d   : > { %1106 = vst [vmem:[#allocation3 + $0x58] sm:$0xff] %v1000_v0  ;;  %1108 = vst [vmem:[#allocation3 + $0xc8] sm:$0xff] %v1073_v1  ;;  %v1002_v6 = vadd.f32 %v1001_v2, %v3147_v41  ;;  %v1075_v7 = vadd.f32 %v1074_v3, %v3150_v43 }
 0x22e   : > { %v1003_v44 = vpop.f32.mrf.mxu0  ;;  %v1076_v40 = vpop.f32.mrf.mxu1 }
 0x22f   : > { %1109 = vst [vmem:[#allocation3 + $0xe0] sm:$0xff] %v1002_v6  ;;  %1111 = vst [vmem:[#allocation3 + $0x70] sm:$0xff] %v1075_v7  ;;  %v1004_v49 = vadd.f32 %v1003_v44, %v3153_v46  ;;  %v1077_v34 = vadd.f32 %v1076_v40, %v3156_v32 }
 0x230   : > { %v1007_v51 = vpop.f32.mrf.mxu0  ;;  %v1080_v35 = vpop.f32.mrf.mxu1 }
 0x231   : > { %1110 = vst [vmem:[#allocation3 + $0x90] sm:$0xff] %v1004_v49  ;;  %1112 = vst [vmem:[#allocation3 + $0xc0] sm:$0xff] %v1077_v34  ;;  %v1008_v36 = vadd.f32 %v1007_v51, %v3147_v41  ;;  %v1081_v42 = vadd.f32 %v1080_v35, %v3150_v43 }
 0x232   : > { %v1009_v37 = vpop.f32.mrf.mxu0  ;;  %v1082_v45 = vpop.f32.mrf.mxu1 }
 0x233   : > { %1113 = vst [vmem:[#allocation3 + $0xa8] sm:$0xff] %v1008_v36  ;;  %1115 = vst [vmem:[#allocation3 + $0x10] sm:$0xff] %v1081_v42  ;;  %v1010_v38 = vadd.f32 %v1009_v37, %v3153_v46  ;;  %v1083_v47 = vadd.f32 %v1082_v45, %v3156_v32 }
 0x234   : > { %v1011_v33 = vpop.f32.mrf.mxu0  ;;  %v1084_v28 = vpop.f32.mrf.mxu1 }
 0x235   : > { %1114 = vst [vmem:[#allocation3 + $0xd0] sm:$0xff] %v1010_v38  ;;  %1116 = vst [vmem:[#allocation3 + $0x28] sm:$0xff] %v1083_v47  ;;  %v1012_v29 = vadd.f32 %v1011_v33, %v3147_v41  ;;  %v1085_v30 = vadd.f32 %v1084_v28, %v3150_v43 }
 0x236   : > { %v1013_v24 = vpop.f32.mrf.mxu0  ;;  %v1086_v25 = vpop.f32.mrf.mxu1 }
 0x237   : > { %1117 = vst [vmem:[#allocation3 + $0xa0] sm:$0xff] %v1012_v29  ;;  %1119 = vst [vmem:[#allocation3 + $0x20] sm:$0xff] %v1085_v30  ;;  %v1014_v26 = vadd.f32 %v1013_v24, %v3153_v46  ;;  %v1087_v27 = vadd.f32 %v1086_v25, %v3156_v32 }
 0x239   : > { %1118 = vst [vmem:[#allocation3 + $0xf8] sm:$0xff] %v1014_v26  ;;  %1120 = vst [vmem:[#allocation3 + $0x98] sm:$0xff] %v1087_v27 }
 0x23a PF: > { %v3192_v31 = vcombine.high %v2931_v60, %v2937_v62  ;;  %v3196_v41 = vcombine.low %v2931_v60, %v2937_v62  ;;  %v3200_v43 = vcombine.high %v2919_v56, %v2925_v58  ;;  %v3204_v46 = vcombine.high %v2934_v61, %v2940_v63  ;;  %v3670_v20 = vld [vmem:[#allocation21_spill] sm:$0xff]  ;;  %v3671_v21 = vld [vmem:[#allocation20_spill] sm:$0xff]  ;;  %v3674_v16 = vld [vmem:[#allocation19_spill] sm:$0xff]  ;;  %p2490_p7 = scmp.ne.s32.totalorder %s2673_s15, 1 }
 0x23b   : > { %v3209_v32 = vcombine.low %v2934_v61, %v2940_v63  ;;  %v3213_v39 = vcombine.high %v2922_v57, %v2928_v59  ;;  %v3218_v60 = vcombine.low %v2919_v56, %v2925_v58  ;;  %v3224_v62 = vcombine.high %v2904_v52, %v2913_v54  ;;  %v3673_v23 = vld [vmem:[#allocation16_spill] sm:$0xff]  ;;  %v3675_v17 = vld [vmem:[#allocation17_spill] sm:$0xff]  ;;  %v3678_v14 = vld [vmem:[#allocation15_spill] sm:$0xff] }
 0x23c   : > { %1288 = vmatprep.subr.bf16.mxu0 %v3192_v31  ;;  %1329 = vmatprep.subr.bf16.mxu1 %v3204_v46  ;;  %v3229_v61 = vcombine.low %v2922_v57, %v2928_v59  ;;  %v3234_v56 = vcombine.high %v2907_v53, %v2916_v55  ;;  %v2685_v58 = vmov 0   ;;  %v3240_v63 = vcombine.low %v2904_v52, %v2913_v54  ;;  %v3672_v54 = vld [vmem:[#allocation18_spill] sm:$0xff]  ;;  %v3677_v19 = vld [vmem:[#allocation12_spill] sm:$0xff]  ;;  %v3679_v15 = vld [vmem:[#allocation13_spill] sm:$0xff] }
 0x23d   : > { %1289 = vmatpush1.bf16.msra.mxu0 %v3196_v41  ;;  %1330 = vmatpush1.bf16.msra.mxu1 %v3209_v32  ;;  %v3245_v57 = vcombine.high %v2892_v48, %v2898_v50  ;;  %v3250_v59 = vcombine.low %v2907_v53, %v2916_v55  ;;  %v3255_v22 = vcombine.high %v3671_v21, %v3670_v20  ;;  %v3680_v10 = vld [vmem:[#allocation10_spill] sm:$0xff]  ;;  %v3681_v11 = vld [vmem:[#allocation8_spill] sm:$0xff]  ;;  %v3682_v0 = vld [vmem:[#allocation11_spill] sm:$0xff] }
 0x23e   : > { %1290 = vmatprep.subr.bf16.mxu0 %v3200_v43  ;;  %1331 = vmatprep.subr.bf16.mxu1 %v3213_v39  ;;  %v3261_v52 = vcombine.low %v2892_v48, %v2898_v50  ;;  %v3266_v53 = vcombine.high %v3673_v23, %v3672_v54  ;;  %v3271_v55 = vcombine.low %v3671_v21, %v3670_v20  ;;  %v3676_v50 = vld [vmem:[#allocation14_spill] sm:$0xff]  ;;  %v3683_v1 = vld [vmem:[#allocation9_spill] sm:$0xff]  ;;  %v3685_v7 = vld [vmem:[#allocation4_spill] sm:$0xff] }
 0x23f   : > { %1320 = vmatprep.mubr.bf16.mxu0 %v2685_v58  ;;  %1361 = vmatprep.mubr.bf16.mxu1 %v2685_v58  ;;  %v3276_v18 = vcombine.high %v3675_v17, %v3674_v16  ;;  %v3281_v48 = vcombine.low %v3673_v23, %v3672_v54  ;;  %v3286_v12 = vcombine.high %v3677_v19, %v3676_v50  ;;  %v3684_v6 = vld [vmem:[#allocation6_spill] sm:$0xff]  ;;  %v3686_v49 = vld [vmem:[#allocation7_spill] sm:$0xff]  ;;  %v3687_v34 = vld [vmem:[#allocation5_spill] sm:$0xff] }
 0x240   : > { %v3291_v13 = vcombine.low %v3675_v17, %v3674_v16  ;;  %v3296_v8 = vcombine.high %v3679_v15, %v3678_v14  ;;  %v3301_v9 = vcombine.low %v3677_v19, %v3676_v50  ;;  %v3306_v4 = vcombine.high %v3681_v11, %v3680_v10  ;;  %v1124_v42 = vld [vmem:[#allocation3 + $0xb0] sm:$0xff]  ;;  %v1125_v45 = vld [vmem:[#allocation3] sm:$0xff]  ;;  %v1127_v21 = vld [vmem:[#allocation3 + $0x18] sm:$0xff] }
 0x241   : > { %1291 = vmatpush1.bf16.msra.mxu0 %v3218_v60  ;;  %1332 = vmatpush1.bf16.msra.mxu1 %v3229_v61  ;;  %v3311_v5 = vcombine.low %v3679_v15, %v3678_v14  ;;  %v3316_v2 = vcombine.high %v3683_v1, %v3682_v0  ;;  %v3321_v3 = vcombine.low %v3681_v11, %v3680_v10  ;;  %v1126_v54 = vld [vmem:[#allocation3 + $0xd8] sm:$0xff] }
 0x242   : > { %1292 = vmatprep.subr.bf16.mxu0 %v3224_v62  ;;  %1333 = vmatprep.subr.bf16.mxu1 %v3234_v56  ;;  %v3326_v44 = vcombine.high %v3685_v7, %v3684_v6  ;;  %v3331_v40 = vcombine.low %v3683_v1, %v3682_v0  ;;  %v3336_v51 = vcombine.high %v3687_v34, %v3686_v49 }
 0x243   : > { %v3341_v35 = vcombine.low %v3685_v7, %v3684_v6  ;;  %v3347_v36 = vcombine.low %v3687_v34, %v3686_v49 }
 0x245   : > { %1293 = vmatpush1.bf16.msra.mxu0 %v3240_v63  ;;  %1334 = vmatpush1.bf16.msra.mxu1 %v3250_v59 }
 0x246   : > { %1294 = vmatprep.subr.bf16.mxu0 %v3245_v57  ;;  %1335 = vmatprep.subr.bf16.mxu1 %v3255_v22 }
 0x249   : > { %1295 = vmatpush1.bf16.msra.mxu0 %v3261_v52  ;;  %1336 = vmatpush1.bf16.msra.mxu1 %v3271_v55 }
 0x24a   : > { %1296 = vmatprep.subr.bf16.mxu0 %v3266_v53  ;;  %1337 = vmatprep.subr.bf16.mxu1 %v3276_v18 }
 0x24d   : > { %1297 = vmatpush1.bf16.msra.mxu0 %v3281_v48  ;;  %1338 = vmatpush1.bf16.msra.mxu1 %v3291_v13 }
 0x24e   : > { %1298 = vmatprep.subr.bf16.mxu0 %v3286_v12  ;;  %1339 = vmatprep.subr.bf16.mxu1 %v3296_v8 }
 0x251   : > { %1299 = vmatpush1.bf16.msra.mxu0 %v3301_v9  ;;  %1340 = vmatpush1.bf16.msra.mxu1 %v3311_v5 }
 0x252   : > { %1300 = vmatprep.subr.bf16.mxu0 %v3306_v4  ;;  %1341 = vmatprep.subr.bf16.mxu1 %v3316_v2 }
 0x255   : > { %1301 = vmatpush1.bf16.msra.mxu0 %v3321_v3  ;;  %1342 = vmatpush1.bf16.msra.mxu1 %v3331_v40 }
 0x256   : > { %1302 = vmatprep.subr.bf16.mxu0 %v3326_v44  ;;  %1343 = vmatprep.subr.bf16.mxu1 %v3336_v51 }
 0x259   : > { %1303 = vmatpush1.bf16.msra.mxu0 %v3341_v35  ;;  %1344 = vmatpush1.bf16.msra.mxu1 %v3347_v36 }
 0x25a   : > { %1407 = vmatprep.subr.bf16.mxu0 %v3192_v31  ;;  %1448 = vmatprep.subr.bf16.mxu1 %v3204_v46 }
 0x25c   : > { %1321 = vmatmul.mubr.bf16.vlgmr.msra.gmra.mxu0 %v2685_v58  ;;  %1362 = vmatmul.mubr.bf16.vlgmr.msra.gmra.mxu1 %v2685_v58 }
 0x25d   : > { %1408 = vmatpush1.bf16.msra.mxu0 %v3196_v41  ;;  %1449 = vmatpush1.bf16.msra.mxu1 %v3209_v32 }
 0x25e   : > { %1409 = vmatprep.subr.bf16.mxu0 %v3200_v43  ;;  %1450 = vmatprep.subr.bf16.mxu1 %v3213_v39 }
 0x25f   : > { %1439 = vmatprep.mubr.bf16.mxu0 %v2685_v58  ;;  %1480 = vmatprep.mubr.bf16.mxu1 %v2685_v58 }
 0x261   : > { %1410 = vmatpush1.bf16.msra.mxu0 %v3218_v60  ;;  %1451 = vmatpush1.bf16.msra.mxu1 %v3229_v61 }
 0x262   : > { %1411 = vmatprep.subr.bf16.mxu0 %v3224_v62  ;;  %1452 = vmatprep.subr.bf16.mxu1 %v3234_v56 }
 0x265   : > { %1412 = vmatpush1.bf16.msra.mxu0 %v3240_v63  ;;  %1453 = vmatpush1.bf16.msra.mxu1 %v3250_v59 }
 0x266   : > { %1413 = vmatprep.subr.bf16.mxu0 %v3245_v57  ;;  %1454 = vmatprep.subr.bf16.mxu1 %v3255_v22 }
 0x269   : > { %1414 = vmatpush1.bf16.msra.mxu0 %v3261_v52  ;;  %1455 = vmatpush1.bf16.msra.mxu1 %v3271_v55 }
 0x26a   : > { %1415 = vmatprep.subr.bf16.mxu0 %v3266_v53  ;;  %1456 = vmatprep.subr.bf16.mxu1 %v3276_v18 }
 0x26d   : > { %1416 = vmatpush1.bf16.msra.mxu0 %v3281_v48  ;;  %1457 = vmatpush1.bf16.msra.mxu1 %v3291_v13 }
 0x26e   : > { %1417 = vmatprep.subr.bf16.mxu0 %v3286_v12  ;;  %1458 = vmatprep.subr.bf16.mxu1 %v3296_v8 }
 0x271   : > { %1418 = vmatpush1.bf16.msra.mxu0 %v3301_v9  ;;  %1459 = vmatpush1.bf16.msra.mxu1 %v3311_v5 }
 0x272   : > { %1419 = vmatprep.subr.bf16.mxu0 %v3306_v4  ;;  %1460 = vmatprep.subr.bf16.mxu1 %v3316_v2 }
 0x275   : > { %1420 = vmatpush1.bf16.msra.mxu0 %v3321_v3  ;;  %1461 = vmatpush1.bf16.msra.mxu1 %v3331_v40 }
 0x276   : > { %1421 = vmatprep.subr.bf16.mxu0 %v3326_v44  ;;  %1462 = vmatprep.subr.bf16.mxu1 %v3336_v51 }
 0x279   : > { %1422 = vmatpush1.bf16.msra.mxu0 %v3341_v35  ;;  %1463 = vmatpush1.bf16.msra.mxu1 %v3347_v36 }
 0x27a   : > { %1527 = vmatprep.subr.bf16.mxu0 %v3192_v31  ;;  %1568 = vmatprep.subr.bf16.mxu1 %v3204_v46 }
 0x31c   : > { %v1322_v37 = vpop.f32.mrf.mxu0  ;;  %v1363_v47 = vpop.f32.mrf.mxu1 }
 0x31d   : > { %v1370_v38 = vadd.f32 %v1322_v37, %v1124_v42  ;;  %v1372_v16 = vadd.f32 %v1363_v47, %v1126_v54  ;;  %v1403_v47 = vld [vmem:[#allocation3 + $0x50] sm:$0xff] }
 0x31e   : > { %v1324_v33 = vpop.f32.mrf.mxu0  ;;  %v1365_v30 = vpop.f32.mrf.mxu1 }
 0x31f   : > { %v2466_v28 = vmul.f32 -1.442695, %v1370_v38  ;;  %v1371_v29 = vadd.f32 %v1324_v33, %v1125_v45  ;;  %v1373_v23 = vadd.f32 %v1365_v30, %v1127_v21 }
 0x320   : > { %v1326_v24 = vpop.f32.mrf.mxu0  ;;  %v1367_v26 = vpop.f32.mrf.mxu1 }
 0x321   : > { %2531 = vpow2.f32 %v2466_v28  ;;  %v2467_v25 = vmul.f32 -1.442695, %v1371_v29  ;;  %v2468_v17 = vmul.f32 -1.442695, %v1373_v23  ;;  %v1404_v29 = vld [vmem:[#allocation3 + $0x68] sm:$0xff] }
 0x322   : > { %v1327_v27 = vpop.f32.mrf.mxu0  ;;  %v1368_v20 = vpop.f32.mrf.mxu1 }
 0x323   : > { %2533 = vpow2.f32 %v2467_v25 }
 0x324   : > { %2535 = vtanh.f32 %v1372_v16 }
 0x325   : > { %2537 = vpow2.f32 %v2468_v17  ;;  %v1406_v17 = vld [vmem:[#allocation3 + $0x48] sm:$0xff] }
 0x32e   : > { %v2532_v50 = vpop.eup %2531 }
 0x32f   : > { %v1377_v19 = vadd.f32 1.0, %v2532_v50 }
 0x330   : > { %v2534_v14 = vpop.eup %2533 }
 0x331   : > { %2539 = vrcp.f32 %v1377_v19  ;;  %v1383_v15 = vadd.f32 1.0, %v2534_v14  ;;  %v2536_v10 = vpop.eup %2535  ;;  %v1405_v19 = vld [vmem:[#allocation3 + $0x30] sm:$0xff] }
 0x332   : > { %v2538_v11 = vpop.eup %2537 }
 0x333   : > { %2541 = vrcp.f32 %v1383_v15  ;;  %v1390_v6 = vadd.f32 1.0, %v2538_v11 }
 0x335   : > { %2543 = vrcp.f32 %v1390_v6 }
 0x33e   : > { %v2540_v0 = vpop.eup %2539 }
 0x33f   : > { %v1394_v49 = vmul.f32 %v2540_v0, %v2536_v10 }
 0x340   : > { %v2542_v1 = vpop.eup %2541 }
 0x341   : > { %v1393_v7 = vmul.f32 0.0, %v2542_v1 }
 0x342   : > { %v2544_v42 = vpop.eup %2543 }
 0x343   : > { %v3390_v34 = vadd.f32 %v1394_v49, %v1393_v7 }
 0x345   : > { %2545 = vtanh.f32 %v3390_v34 }
 0x352   : > { %v2546_v37 = vpop.eup %2545 }
 0x353   : > { %v1397_v45 = vmul.f32 %v2546_v37, %v2544_v42 }
 0x355   : > { %v1398_v38 = vpack.c.bf16 %v1397_v45, %v1397_v45 }
 0x357   : > { %1399 = vst [vmem:[#allocation2] sm:$0xf] %v1398_v38  ;;  %1440 = vmatmul.mubr.bf16.vlgmr.msra.gmra.mxu0 %v1398_v38  ;;  %1481 = vmatmul.mubr.bf16.vlgmr.msra.gmra.mxu1 %v1398_v38 }
 0x358   : > { %1528 = vmatpush1.bf16.msra.mxu0 %v3196_v41  ;;  %1569 = vmatpush1.bf16.msra.mxu1 %v3209_v32 }
 0x359   : > { %1529 = vmatprep.subr.bf16.mxu0 %v3200_v43  ;;  %1570 = vmatprep.subr.bf16.mxu1 %v3213_v39 }
 0x35a   : > { %1559 = vmatprep.mubr.bf16.mxu0 %v2685_v58  ;;  %1600 = vmatprep.mubr.bf16.mxu1 %v2685_v58 }
 0x35c   : > { %1530 = vmatpush1.bf16.msra.mxu0 %v3218_v60  ;;  %1571 = vmatpush1.bf16.msra.mxu1 %v3229_v61 }
 0x35d   : > { %1531 = vmatprep.subr.bf16.mxu0 %v3224_v62  ;;  %1572 = vmatprep.subr.bf16.mxu1 %v3234_v56 }
 0x360   : > { %1532 = vmatpush1.bf16.msra.mxu0 %v3240_v63  ;;  %1573 = vmatpush1.bf16.msra.mxu1 %v3250_v59 }
 0x361   : > { %1533 = vmatprep.subr.bf16.mxu0 %v3245_v57  ;;  %1574 = vmatprep.subr.bf16.mxu1 %v3255_v22 }
 0x364   : > { %1534 = vmatpush1.bf16.msra.mxu0 %v3261_v52  ;;  %1575 = vmatpush1.bf16.msra.mxu1 %v3271_v55 }
 0x365   : > { %1535 = vmatprep.subr.bf16.mxu0 %v3266_v53  ;;  %1576 = vmatprep.subr.bf16.mxu1 %v3276_v18 }
 0x368   : > { %1536 = vmatpush1.bf16.msra.mxu0 %v3281_v48  ;;  %1577 = vmatpush1.bf16.msra.mxu1 %v3291_v13 }
 0x369   : > { %1537 = vmatprep.subr.bf16.mxu0 %v3286_v12  ;;  %1578 = vmatprep.subr.bf16.mxu1 %v3296_v8 }
 0x36c   : > { %1538 = vmatpush1.bf16.msra.mxu0 %v3301_v9  ;;  %1579 = vmatpush1.bf16.msra.mxu1 %v3311_v5 }
 0x36d   : > { %1539 = vmatprep.subr.bf16.mxu0 %v3306_v4  ;;  %1580 = vmatprep.subr.bf16.mxu1 %v3316_v2 }
 0x370   : > { %1540 = vmatpush1.bf16.msra.mxu0 %v3321_v3  ;;  %1581 = vmatpush1.bf16.msra.mxu1 %v3331_v40 }
 0x371   : > { %1541 = vmatprep.subr.bf16.mxu0 %v3326_v44  ;;  %1582 = vmatprep.subr.bf16.mxu1 %v3336_v51 }
 0x374   : > { %1542 = vmatpush1.bf16.msra.mxu0 %v3341_v35  ;;  %1583 = vmatpush1.bf16.msra.mxu1 %v3347_v36 }
 0x375   : > { %1647 = vmatprep.subr.bf16.mxu0 %v3192_v31  ;;  %1688 = vmatprep.subr.bf16.mxu1 %v3204_v46 }
 0x417   : > { %v1441_v33 = vpop.f32.mrf.mxu0  ;;  %v1482_v28 = vpop.f32.mrf.mxu1 }
 0x418   : > { %v1489_v30 = vadd.f32 %v1441_v33, %v1403_v47  ;;  %v1491_v10 = vadd.f32 %v1482_v28, %v1405_v19 }
 0x419   : > { %v1443_v24 = vpop.f32.mrf.mxu0  ;;  %v1484_v25 = vpop.f32.mrf.mxu1 }
 0x41a   : > { %v2469_v26 = vmul.f32 -1.442695, %v1489_v30  ;;  %v1490_v27 = vadd.f32 %v1443_v24, %v1404_v29  ;;  %v1492_v50 = vadd.f32 %v1484_v25, %v1406_v17 }
 0x41b   : > { %v1445_v20 = vpop.f32.mrf.mxu0  ;;  %v1486_v21 = vpop.f32.mrf.mxu1 }
 0x41c   : > { %2547 = vpow2.f32 %v2469_v26  ;;  %v2470_v54 = vmul.f32 -1.442695, %v1490_v27  ;;  %v2471_v14 = vmul.f32 -1.442695, %v1492_v50  ;;  %v1524_v26 = vld [vmem:[#allocation3 + $0x88] sm:$0xff] }
 0x41d   : > { %v1446_v23 = vpop.f32.mrf.mxu0  ;;  %v1487_v16 = vpop.f32.mrf.mxu1 }
 0x41e   : > { %2549 = vpow2.f32 %v2470_v54 }
 0x41f   : > { %2551 = vpow2.f32 %v2471_v14 }
 0x429   : > { %v2548_v15 = vpop.eup %2547 }
 0x42a   : > { %v1496_v11 = vadd.f32 1.0, %v2548_v15  ;;  %v1526_v15 = vld [vmem:[#allocation3 + $0xb8] sm:$0xff] }
 0x42b   : > { %v2550_v0 = vpop.eup %2549 }
 0x42c   : > { %2553 = vrcp.f32 %v1496_v11  ;;  %v1502_v1 = vadd.f32 1.0, %v2550_v0  ;;  %v2552_v6 = vpop.eup %2551  ;;  %v1525_v11 = vld [vmem:[#allocation3 + $0xe8] sm:$0xff] }
 0x42d   : > { %2555 = vtanh.f32 %v1491_v10  ;;  %v1509_v37 = vadd.f32 1.0, %v2552_v6 }
 0x42e   : > { %2557 = vrcp.f32 %v1502_v1 }
 0x42f   : > { %2559 = vrcp.f32 %v1509_v37 }
 0x439   : > { %v2554_v7 = vpop.eup %2553 }
 0x43a   : > { %v2556_v49 = vpop.eup %2555 }
 0x43b   : > { %v2558_v42 = vpop.eup %2557  ;;  %v1513_v45 = vmul.f32 %v2556_v49, %v2554_v7 }
 0x43c   : > { %v1512_v38 = vmul.f32 %v2558_v42, %v3390_v34  ;;  %v2560_v33 = vpop.eup %2559  ;;  %v1523_v34 = vld [vmem:[#allocation3 + $0x80] sm:$0xff] }
 0x43e   : > { %v3428_v47 = vadd.f32 %v1513_v45, %v1512_v38 }
 0x440   : > { %2561 = vtanh.f32 %v3428_v47 }
 0x44d   : > { %v2562_v28 = vpop.eup %2561 }
 0x44e   : > { %v1516_v29 = vmul.f32 %v2562_v28, %v2560_v33 }
 0x450   : > { %v1517_v30 = vpack.c.bf16 %v1516_v29, %v1516_v29 }
 0x452   : > { %1519 = vst [vmem:[#allocation2 + $0x4] sm:$0xf] %v1517_v30  ;;  %1560 = vmatmul.mubr.bf16.vlgmr.msra.gmra.mxu0 %v1517_v30  ;;  %1601 = vmatmul.mubr.bf16.vlgmr.msra.gmra.mxu1 %v1517_v30 }
 0x453   : > { %1648 = vmatpush1.bf16.msra.mxu0 %v3196_v41  ;;  %1689 = vmatpush1.bf16.msra.mxu1 %v3209_v32 }
 0x454   : > { %1649 = vmatprep.subr.bf16.mxu0 %v3200_v43  ;;  %1690 = vmatprep.subr.bf16.mxu1 %v3213_v39 }
 0x455   : > { %1679 = vmatprep.mubr.bf16.mxu0 %v2685_v58  ;;  %1720 = vmatprep.mubr.bf16.mxu1 %v2685_v58 }
 0x457   : > { %1650 = vmatpush1.bf16.msra.mxu0 %v3218_v60  ;;  %1691 = vmatpush1.bf16.msra.mxu1 %v3229_v61 }
 0x458   : > { %1651 = vmatprep.subr.bf16.mxu0 %v3224_v62  ;;  %1692 = vmatprep.subr.bf16.mxu1 %v3234_v56 }
 0x45b   : > { %1652 = vmatpush1.bf16.msra.mxu0 %v3240_v63  ;;  %1693 = vmatpush1.bf16.msra.mxu1 %v3250_v59 }
 0x45c   : > { %1653 = vmatprep.subr.bf16.mxu0 %v3245_v57  ;;  %1694 = vmatprep.subr.bf16.mxu1 %v3255_v22 }
 0x45f   : > { %1654 = vmatpush1.bf16.msra.mxu0 %v3261_v52  ;;  %1695 = vmatpush1.bf16.msra.mxu1 %v3271_v55 }
 0x460   : > { %1655 = vmatprep.subr.bf16.mxu0 %v3266_v53  ;;  %1696 = vmatprep.subr.bf16.mxu1 %v3276_v18 }
 0x463   : > { %1656 = vmatpush1.bf16.msra.mxu0 %v3281_v48  ;;  %1697 = vmatpush1.bf16.msra.mxu1 %v3291_v13 }
 0x464   : > { %1657 = vmatprep.subr.bf16.mxu0 %v3286_v12  ;;  %1698 = vmatprep.subr.bf16.mxu1 %v3296_v8 }
 0x467   : > { %1658 = vmatpush1.bf16.msra.mxu0 %v3301_v9  ;;  %1699 = vmatpush1.bf16.msra.mxu1 %v3311_v5 }
 0x468   : > { %1659 = vmatprep.subr.bf16.mxu0 %v3306_v4  ;;  %1700 = vmatprep.subr.bf16.mxu1 %v3316_v2 }
 0x46b   : > { %1660 = vmatpush1.bf16.msra.mxu0 %v3321_v3  ;;  %1701 = vmatpush1.bf16.msra.mxu1 %v3331_v40 }
 0x46c   : > { %1661 = vmatprep.subr.bf16.mxu0 %v3326_v44  ;;  %1702 = vmatprep.subr.bf16.mxu1 %v3336_v51 }
 0x46f   : > { %1662 = vmatpush1.bf16.msra.mxu0 %v3341_v35  ;;  %1703 = vmatpush1.bf16.msra.mxu1 %v3347_v36 }
 0x470   : > { %1767 = vmatprep.subr.bf16.mxu0 %v3192_v31  ;;  %1808 = vmatprep.subr.bf16.mxu1 %v3204_v46 }
 0x512   : > { %v1561_v24 = vpop.f32.mrf.mxu0  ;;  %v1602_v25 = vpop.f32.mrf.mxu1 }
 0x513   : > { %v1609_v27 = vadd.f32 %v1561_v24, %v1523_v34  ;;  %v1611_v6 = vadd.f32 %v1602_v25, %v1525_v11 }
 0x514   : > { %v1563_v20 = vpop.f32.mrf.mxu0  ;;  %v1604_v21 = vpop.f32.mrf.mxu1 }
 0x515   : > { %v2472_v54 = vmul.f32 -1.442695, %v1609_v27  ;;  %v1610_v23 = vadd.f32 %v1563_v20, %v1524_v26  ;;  %v1612_v10 = vadd.f32 %v1604_v21, %v1526_v15 }
 0x516   : > { %v1565_v16 = vpop.f32.mrf.mxu0  ;;  %v1606_v17 = vpop.f32.mrf.mxu1 }
 0x517   : > { %2563 = vpow2.f32 %v2472_v54  ;;  %v2473_v50 = vmul.f32 -1.442695, %v1610_v23  ;;  %v2474_v0 = vmul.f32 -1.442695, %v1612_v10  ;;  %v1644_v54 = vld [vmem:[#allocation3 + $0xf0] sm:$0xff] }
 0x518   : > { %v1566_v19 = vpop.f32.mrf.mxu0  ;;  %v1607_v14 = vpop.f32.mrf.mxu1 }
 0x519   : > { %2565 = vpow2.f32 %v2473_v50 }
 0x51a   : > { %2567 = vpow2.f32 %v2474_v0 }
 0x524   : > { %v2564_v1 = vpop.eup %2563 }
 0x525   : > { %v1616_v7 = vadd.f32 1.0, %v2564_v1  ;;  %v1646_v1 = vld [vmem:[#allocation3 + $0x78] sm:$0xff] }
 0x526   : > { %v2566_v49 = vpop.eup %2565 }
 0x527   : > { %2569 = vrcp.f32 %v1616_v7  ;;  %v1622_v42 = vadd.f32 1.0, %v2566_v49  ;;  %v2568_v37 = vpop.eup %2567  ;;  %v1645_v7 = vld [vmem:[#allocation3 + $0x8] sm:$0xff] }
 0x528   : > { %2571 = vtanh.f32 %v1611_v6  ;;  %v1629_v28 = vadd.f32 1.0, %v2568_v37 }
 0x529   : > { %2573 = vrcp.f32 %v1622_v42 }
 0x52a   : > { %2575 = vrcp.f32 %v1629_v28 }
 0x534   : > { %v2570_v45 = vpop.eup %2569 }
 0x535   : > { %v2572_v38 = vpop.eup %2571 }
 0x536   : > { %v2574_v33 = vpop.eup %2573  ;;  %v1633_v29 = vmul.f32 %v2572_v38, %v2570_v45 }
 0x537   : > { %v1632_v30 = vmul.f32 %v2574_v33, %v3428_v47  ;;  %v2576_v24 = vpop.eup %2575  ;;  %v1643_v47 = vld [vmem:[#allocation3 + $0x60] sm:$0xff] }
 0x539   : > { %v3466_v34 = vadd.f32 %v1633_v29, %v1632_v30 }
 0x53b   : > { %2577 = vtanh.f32 %v3466_v34 }
 0x548   : > { %v2578_v25 = vpop.eup %2577 }
 0x549   : > { %v1636_v26 = vmul.f32 %v2578_v25, %v2576_v24 }
 0x54b   : > { %v1637_v27 = vpack.c.bf16 %v1636_v26, %v1636_v26 }
 0x54d   : > { %1639 = vst [vmem:[#allocation2 + $0x8] sm:$0xf] %v1637_v27  ;;  %1680 = vmatmul.mubr.bf16.vlgmr.msra.gmra.mxu0 %v1637_v27  ;;  %1721 = vmatmul.mubr.bf16.vlgmr.msra.gmra.mxu1 %v1637_v27 }
 0x54e   : > { %1768 = vmatpush1.bf16.msra.mxu0 %v3196_v41  ;;  %1809 = vmatpush1.bf16.msra.mxu1 %v3209_v32 }
 0x54f   : > { %1769 = vmatprep.subr.bf16.mxu0 %v3200_v43  ;;  %1810 = vmatprep.subr.bf16.mxu1 %v3213_v39 }
 0x550   : > { %1799 = vmatprep.mubr.bf16.mxu0 %v2685_v58  ;;  %1840 = vmatprep.mubr.bf16.mxu1 %v2685_v58 }
 0x552   : > { %1770 = vmatpush1.bf16.msra.mxu0 %v3218_v60  ;;  %1811 = vmatpush1.bf16.msra.mxu1 %v3229_v61 }
 0x553   : > { %1771 = vmatprep.subr.bf16.mxu0 %v3224_v62  ;;  %1812 = vmatprep.subr.bf16.mxu1 %v3234_v56 }
 0x556   : > { %1772 = vmatpush1.bf16.msra.mxu0 %v3240_v63  ;;  %1813 = vmatpush1.bf16.msra.mxu1 %v3250_v59 }
 0x557   : > { %1773 = vmatprep.subr.bf16.mxu0 %v3245_v57  ;;  %1814 = vmatprep.subr.bf16.mxu1 %v3255_v22 }
 0x55a   : > { %1774 = vmatpush1.bf16.msra.mxu0 %v3261_v52  ;;  %1815 = vmatpush1.bf16.msra.mxu1 %v3271_v55 }
 0x55b   : > { %1775 = vmatprep.subr.bf16.mxu0 %v3266_v53  ;;  %1816 = vmatprep.subr.bf16.mxu1 %v3276_v18 }
 0x55e   : > { %1776 = vmatpush1.bf16.msra.mxu0 %v3281_v48  ;;  %1817 = vmatpush1.bf16.msra.mxu1 %v3291_v13 }
 0x55f   : > { %1777 = vmatprep.subr.bf16.mxu0 %v3286_v12  ;;  %1818 = vmatprep.subr.bf16.mxu1 %v3296_v8 }
 0x562   : > { %1778 = vmatpush1.bf16.msra.mxu0 %v3301_v9  ;;  %1819 = vmatpush1.bf16.msra.mxu1 %v3311_v5 }
 0x563   : > { %1779 = vmatprep.subr.bf16.mxu0 %v3306_v4  ;;  %1820 = vmatprep.subr.bf16.mxu1 %v3316_v2 }
 0x566   : > { %1780 = vmatpush1.bf16.msra.mxu0 %v3321_v3  ;;  %1821 = vmatpush1.bf16.msra.mxu1 %v3331_v40 }
 0x567   : > { %1781 = vmatprep.subr.bf16.mxu0 %v3326_v44  ;;  %1822 = vmatprep.subr.bf16.mxu1 %v3336_v51 }
 0x56a   : > { %1782 = vmatpush1.bf16.msra.mxu0 %v3341_v35  ;;  %1823 = vmatpush1.bf16.msra.mxu1 %v3347_v36 }
 0x56b   : > { %1887 = vmatprep.subr.bf16.mxu0 %v3192_v31  ;;  %1928 = vmatprep.subr.bf16.mxu1 %v3204_v46 }
 0x60d   : > { %v1681_v20 = vpop.f32.mrf.mxu0  ;;  %v1722_v21 = vpop.f32.mrf.mxu1 }
 0x60e   : > { %v1729_v23 = vadd.f32 %v1681_v20, %v1643_v47  ;;  %v1731_v37 = vadd.f32 %v1722_v21, %v1645_v7 }
 0x60f   : > { %v1683_v16 = vpop.f32.mrf.mxu0  ;;  %v1724_v17 = vpop.f32.mrf.mxu1 }
 0x610   : > { %v2475_v50 = vmul.f32 -1.442695, %v1729_v23  ;;  %v1730_v19 = vadd.f32 %v1683_v16, %v1644_v54  ;;  %v1732_v6 = vadd.f32 %v1724_v17, %v1646_v1 }
 0x611   : > { %v1685_v14 = vpop.f32.mrf.mxu0  ;;  %v1726_v15 = vpop.f32.mrf.mxu1 }
 0x612   : > { %2579 = vpow2.f32 %v2475_v50  ;;  %v2476_v10 = vmul.f32 -1.442695, %v1730_v19  ;;  %v2477_v49 = vmul.f32 -1.442695, %v1732_v6  ;;  %v1764_v50 = vld [vmem:[#allocation3 + $0x58] sm:$0xff] }
 0x613   : > { %v1686_v11 = vpop.f32.mrf.mxu0  ;;  %v1727_v0 = vpop.f32.mrf.mxu1 }
 0x614   : > { %2581 = vpow2.f32 %v2476_v10 }
 0x615   : > { %2583 = vpow2.f32 %v2477_v49 }
 0x61f   : > { %v2580_v42 = vpop.eup %2579 }
 0x620   : > { %v1736_v45 = vadd.f32 1.0, %v2580_v42  ;;  %v1766_v42 = vld [vmem:[#allocation3 + $0xc8] sm:$0xff] }
 0x621   : > { %v2582_v38 = vpop.eup %2581 }
 0x622   : > { %2585 = vrcp.f32 %v1736_v45  ;;  %v1742_v33 = vadd.f32 1.0, %v2582_v38  ;;  %v2584_v28 = vpop.eup %2583  ;;  %v1765_v45 = vld [vmem:[#allocation3 + $0x40] sm:$0xff] }
 0x623   : > { %2587 = vtanh.f32 %v1731_v37  ;;  %v1749_v25 = vadd.f32 1.0, %v2584_v28 }
 0x624   : > { %2589 = vrcp.f32 %v1742_v33 }
 0x625   : > { %2591 = vrcp.f32 %v1749_v25 }
 0x62f   : > { %v2586_v29 = vpop.eup %2585 }
 0x630   : > { %v2588_v30 = vpop.eup %2587 }
 0x631   : > { %v2590_v24 = vpop.eup %2589  ;;  %v1753_v26 = vmul.f32 %v2588_v30, %v2586_v29 }
 0x632   : > { %v1752_v27 = vmul.f32 %v2590_v24, %v3466_v34  ;;  %v2592_v20 = vpop.eup %2591  ;;  %v1763_v34 = vld [vmem:[#allocation3 + $0x38] sm:$0xff] }
 0x634   : > { %v3504_v47 = vadd.f32 %v1753_v26, %v1752_v27 }
 0x636   : > { %2593 = vtanh.f32 %v3504_v47 }
 0x643   : > { %v2594_v21 = vpop.eup %2593 }
 0x644   : > { %v1756_v54 = vmul.f32 %v2594_v21, %v2592_v20 }
 0x646   : > { %v1757_v23 = vpack.c.bf16 %v1756_v54, %v1756_v54 }
 0x648   : > { %1759 = vst [vmem:[#allocation2 + $0xc] sm:$0xf] %v1757_v23  ;;  %1800 = vmatmul.mubr.bf16.vlgmr.msra.gmra.mxu0 %v1757_v23  ;;  %1841 = vmatmul.mubr.bf16.vlgmr.msra.gmra.mxu1 %v1757_v23 }
 0x649   : > { %1888 = vmatpush1.bf16.msra.mxu0 %v3196_v41  ;;  %1929 = vmatpush1.bf16.msra.mxu1 %v3209_v32 }
 0x64a   : > { %1889 = vmatprep.subr.bf16.mxu0 %v3200_v43  ;;  %1930 = vmatprep.subr.bf16.mxu1 %v3213_v39 }
 0x64b   : > { %1919 = vmatprep.mubr.bf16.mxu0 %v2685_v58  ;;  %1960 = vmatprep.mubr.bf16.mxu1 %v2685_v58 }
 0x64d   : > { %1890 = vmatpush1.bf16.msra.mxu0 %v3218_v60  ;;  %1931 = vmatpush1.bf16.msra.mxu1 %v3229_v61 }
 0x64e   : > { %1891 = vmatprep.subr.bf16.mxu0 %v3224_v62  ;;  %1932 = vmatprep.subr.bf16.mxu1 %v3234_v56 }
 0x651   : > { %1892 = vmatpush1.bf16.msra.mxu0 %v3240_v63  ;;  %1933 = vmatpush1.bf16.msra.mxu1 %v3250_v59 }
 0x652   : > { %1893 = vmatprep.subr.bf16.mxu0 %v3245_v57  ;;  %1934 = vmatprep.subr.bf16.mxu1 %v3255_v22 }
 0x655   : > { %1894 = vmatpush1.bf16.msra.mxu0 %v3261_v52  ;;  %1935 = vmatpush1.bf16.msra.mxu1 %v3271_v55 }
 0x656   : > { %1895 = vmatprep.subr.bf16.mxu0 %v3266_v53  ;;  %1936 = vmatprep.subr.bf16.mxu1 %v3276_v18 }
 0x659   : > { %1896 = vmatpush1.bf16.msra.mxu0 %v3281_v48  ;;  %1937 = vmatpush1.bf16.msra.mxu1 %v3291_v13 }
 0x65a   : > { %1897 = vmatprep.subr.bf16.mxu0 %v3286_v12  ;;  %1938 = vmatprep.subr.bf16.mxu1 %v3296_v8 }
 0x65d   : > { %1898 = vmatpush1.bf16.msra.mxu0 %v3301_v9  ;;  %1939 = vmatpush1.bf16.msra.mxu1 %v3311_v5 }
 0x65e   : > { %1899 = vmatprep.subr.bf16.mxu0 %v3306_v4  ;;  %1940 = vmatprep.subr.bf16.mxu1 %v3316_v2 }
 0x661   : > { %1900 = vmatpush1.bf16.msra.mxu0 %v3321_v3  ;;  %1941 = vmatpush1.bf16.msra.mxu1 %v3331_v40 }
 0x662   : > { %1901 = vmatprep.subr.bf16.mxu0 %v3326_v44  ;;  %1942 = vmatprep.subr.bf16.mxu1 %v3336_v51 }
 0x665   : > { %1902 = vmatpush1.bf16.msra.mxu0 %v3341_v35  ;;  %1943 = vmatpush1.bf16.msra.mxu1 %v3347_v36 }
 0x666   : > { %2007 = vmatprep.subr.bf16.mxu0 %v3192_v31  ;;  %2048 = vmatprep.subr.bf16.mxu1 %v3204_v46 }
 0x708   : > { %v1801_v16 = vpop.f32.mrf.mxu0  ;;  %v1842_v17 = vpop.f32.mrf.mxu1 }
 0x709   : > { %v1849_v19 = vadd.f32 %v1801_v16, %v1763_v34  ;;  %v1851_v28 = vadd.f32 %v1842_v17, %v1765_v45 }
 0x70a   : > { %v1803_v14 = vpop.f32.mrf.mxu0  ;;  %v1844_v15 = vpop.f32.mrf.mxu1 }
 0x70b   : > { %v2478_v10 = vmul.f32 -1.442695, %v1849_v19  ;;  %v1850_v11 = vadd.f32 %v1803_v14, %v1764_v50  ;;  %v1852_v37 = vadd.f32 %v1844_v15, %v1766_v42 }
 0x70c   : > { %v1805_v0 = vpop.f32.mrf.mxu0  ;;  %v1846_v1 = vpop.f32.mrf.mxu1 }
 0x70d   : > { %2595 = vpow2.f32 %v2478_v10  ;;  %v2479_v6 = vmul.f32 -1.442695, %v1850_v11  ;;  %v2480_v38 = vmul.f32 -1.442695, %v1852_v37  ;;  %v1884_v10 = vld [vmem:[#allocation3 + $0x90] sm:$0xff] }
 0x70e   : > { %v1806_v7 = vpop.f32.mrf.mxu0  ;;  %v1847_v49 = vpop.f32.mrf.mxu1 }
 0x70f   : > { %2597 = vpow2.f32 %v2479_v6 }
 0x710   : > { %2599 = vpow2.f32 %v2480_v38 }
 0x71a   : > { %v2596_v33 = vpop.eup %2595 }
 0x71b   : > { %v1856_v29 = vadd.f32 1.0, %v2596_v33  ;;  %v1886_v33 = vld [vmem:[#allocation3 + $0xc0] sm:$0xff] }
 0x71c   : > { %v2598_v30 = vpop.eup %2597 }
 0x71d   : > { %2601 = vrcp.f32 %v1856_v29  ;;  %v1862_v24 = vadd.f32 1.0, %v2598_v30  ;;  %v2600_v25 = vpop.eup %2599 }
 0x71e   : > { %2603 = vtanh.f32 %v1851_v28  ;;  %v1869_v21 = vadd.f32 1.0, %v2600_v25  ;;  %v1885_v28 = vld [vmem:[#allocation3 + $0x70] sm:$0xff] }
 0x71f   : > { %2605 = vrcp.f32 %v1862_v24 }
 0x720   : > { %2607 = vrcp.f32 %v1869_v21 }
 0x72a   : > { %v2602_v26 = vpop.eup %2601 }
 0x72b   : > { %v2604_v27 = vpop.eup %2603 }
 0x72c   : > { %v2606_v20 = vpop.eup %2605  ;;  %v1873_v54 = vmul.f32 %v2604_v27, %v2602_v26 }
 0x72d   : > { %v1872_v23 = vmul.f32 %v2606_v20, %v3504_v47  ;;  %v2608_v16 = vpop.eup %2607  ;;  %v1883_v47 = vld [vmem:[#allocation3 + $0xe0] sm:$0xff] }
 0x72f   : > { %v3542_v34 = vadd.f32 %v1873_v54, %v1872_v23 }
 0x731   : > { %2609 = vtanh.f32 %v3542_v34 }
 0x73e   : > { %v2610_v17 = vpop.eup %2609 }
 0x73f   : > { %v1876_v50 = vmul.f32 %v2610_v17, %v2608_v16 }
 0x741   : > { %v1877_v19 = vpack.c.bf16 %v1876_v50, %v1876_v50 }
 0x743   : > { %1879 = vst [vmem:[#allocation2 + $0x10] sm:$0xf] %v1877_v19  ;;  %1920 = vmatmul.mubr.bf16.vlgmr.msra.gmra.mxu0 %v1877_v19  ;;  %1961 = vmatmul.mubr.bf16.vlgmr.msra.gmra.mxu1 %v1877_v19 }
 0x744   : > { %2008 = vmatpush1.bf16.msra.mxu0 %v3196_v41  ;;  %2049 = vmatpush1.bf16.msra.mxu1 %v3209_v32 }
 0x745   : > { %2009 = vmatprep.subr.bf16.mxu0 %v3200_v43  ;;  %2050 = vmatprep.subr.bf16.mxu1 %v3213_v39 }
 0x746   : > { %2039 = vmatprep.mubr.bf16.mxu0 %v2685_v58  ;;  %2080 = vmatprep.mubr.bf16.mxu1 %v2685_v58 }
 0x748   : > { %2010 = vmatpush1.bf16.msra.mxu0 %v3218_v60  ;;  %2051 = vmatpush1.bf16.msra.mxu1 %v3229_v61 }
 0x749   : > { %2011 = vmatprep.subr.bf16.mxu0 %v3224_v62  ;;  %2052 = vmatprep.subr.bf16.mxu1 %v3234_v56 }
 0x74c   : > { %2012 = vmatpush1.bf16.msra.mxu0 %v3240_v63  ;;  %2053 = vmatpush1.bf16.msra.mxu1 %v3250_v59 }
 0x74d   : > { %2013 = vmatprep.subr.bf16.mxu0 %v3245_v57  ;;  %2054 = vmatprep.subr.bf16.mxu1 %v3255_v22 }
 0x750   : > { %2014 = vmatpush1.bf16.msra.mxu0 %v3261_v52  ;;  %2055 = vmatpush1.bf16.msra.mxu1 %v3271_v55 }
 0x751   : > { %2015 = vmatprep.subr.bf16.mxu0 %v3266_v53  ;;  %2056 = vmatprep.subr.bf16.mxu1 %v3276_v18 }
 0x754   : > { %2016 = vmatpush1.bf16.msra.mxu0 %v3281_v48  ;;  %2057 = vmatpush1.bf16.msra.mxu1 %v3291_v13 }
 0x755   : > { %2017 = vmatprep.subr.bf16.mxu0 %v3286_v12  ;;  %2058 = vmatprep.subr.bf16.mxu1 %v3296_v8 }
 0x758   : > { %2018 = vmatpush1.bf16.msra.mxu0 %v3301_v9  ;;  %2059 = vmatpush1.bf16.msra.mxu1 %v3311_v5 }
 0x759   : > { %2019 = vmatprep.subr.bf16.mxu0 %v3306_v4  ;;  %2060 = vmatprep.subr.bf16.mxu1 %v3316_v2 }
 0x75c   : > { %2020 = vmatpush1.bf16.msra.mxu0 %v3321_v3  ;;  %2061 = vmatpush1.bf16.msra.mxu1 %v3331_v40 }
 0x75d   : > { %2021 = vmatprep.subr.bf16.mxu0 %v3326_v44  ;;  %2062 = vmatprep.subr.bf16.mxu1 %v3336_v51 }
 0x760   : > { %2022 = vmatpush1.bf16.msra.mxu0 %v3341_v35  ;;  %2063 = vmatpush1.bf16.msra.mxu1 %v3347_v36 }
 0x761   : > { %2127 = vmatprep.subr.bf16.mxu0 %v3192_v31  ;;  %2168 = vmatprep.subr.bf16.mxu1 %v3204_v46 }
 0x803   : > { %v1921_v14 = vpop.f32.mrf.mxu0  ;;  %v1962_v15 = vpop.f32.mrf.mxu1 }
 0x804   : > { %v1969_v11 = vadd.f32 %v1921_v14, %v1883_v47  ;;  %v1971_v30 = vadd.f32 %v1962_v15, %v1885_v28 }
 0x805   : > { %v1923_v0 = vpop.f32.mrf.mxu0  ;;  %v1964_v1 = vpop.f32.mrf.mxu1 }
 0x806   : > { %v2481_v6 = vmul.f32 -1.442695, %v1969_v11  ;;  %v1970_v7 = vadd.f32 %v1923_v0, %v1884_v10  ;;  %v1972_v31 = vadd.f32 %v1964_v1, %v1886_v33  ;;  %v2123_v1 = vld [vmem:[#allocation3 + $0xa0] sm:$0xff] }
 0x807   : > { %v1925_v49 = vpop.f32.mrf.mxu0  ;;  %v1966_v42 = vpop.f32.mrf.mxu1 }
 0x808   : > { %2611 = vpow2.f32 %v2481_v6  ;;  %v2482_v37 = vmul.f32 -1.442695, %v1970_v7  ;;  %v2483_v46 = vmul.f32 -1.442695, %v1972_v31  ;;  %v2124_v49 = vld [vmem:[#allocation3 + $0xf8] sm:$0xff] }
 0x809   : > { %v1926_v45 = vpop.f32.mrf.mxu0  ;;  %v1967_v38 = vpop.f32.mrf.mxu1 }
 0x80a   : > { %2613 = vpow2.f32 %v2482_v37 }
 0x80b   : > { %2615 = vpow2.f32 %v2483_v46 }
 0x815   : > { %v2612_v29 = vpop.eup %2611 }
 0x816   : > { %v1976_v24 = vadd.f32 1.0, %v2612_v29 }
 0x817   : > { %v2614_v25 = vpop.eup %2613 }
 0x818   : > { %2617 = vrcp.f32 %v1976_v24  ;;  %v1982_v26 = vadd.f32 1.0, %v2614_v25  ;;  %v2616_v27 = vpop.eup %2615  ;;  %v2126_v24 = vld [vmem:[#allocation3 + $0x98] sm:$0xff] }
 0x819   : > { %2619 = vtanh.f32 %v1971_v30  ;;  %v1989_v23 = vadd.f32 1.0, %v2616_v27 }
 0x81a   : > { %2621 = vrcp.f32 %v1982_v26  ;;  %v2125_v26 = vld [vmem:[#allocation3 + $0x20] sm:$0xff] }
 0x81b   : > { %2623 = vrcp.f32 %v1989_v23 }
 0x825   : > { %v2618_v20 = vpop.eup %2617 }
 0x826   : > { %v2620_v21 = vpop.eup %2619 }
 0x827   : > { %v2622_v54 = vpop.eup %2621  ;;  %v1993_v16 = vmul.f32 %v2620_v21, %v2618_v20 }
 0x828   : > { %v1992_v17 = vmul.f32 %v2622_v54, %v3542_v34  ;;  %v2624_v19 = vpop.eup %2623 }
 0x82a   : > { %v3580_v50 = vadd.f32 %v1993_v16, %v1992_v17 }
 0x82c   : > { %2625 = vtanh.f32 %v3580_v50 }
 0x839   : > { %v2626_v47 = vpop.eup %2625 }
 0x83a   : > { %v1996_v14 = vmul.f32 %v2626_v47, %v2624_v19 }
 0x83c   : > { %v1997_v15 = vpack.c.bf16 %v1996_v14, %v1996_v14 }
 0x83e   : > { %1999 = vst [vmem:[#allocation2 + $0x14] sm:$0xf] %v1997_v15  ;;  %2040 = vmatmul.mubr.bf16.vlgmr.msra.gmra.mxu0 %v1997_v15  ;;  %2081 = vmatmul.mubr.bf16.vlgmr.msra.gmra.mxu1 %v1997_v15 }
 0x83f   : > { %2128 = vmatpush1.bf16.msra.mxu0 %v3196_v41  ;;  %2169 = vmatpush1.bf16.msra.mxu1 %v3209_v32  ;;  %v2003_v41 = vld [vmem:[#allocation3 + $0xa8] sm:$0xff] }
 0x840   : > { %2129 = vmatprep.subr.bf16.mxu0 %v3200_v43  ;;  %2170 = vmatprep.subr.bf16.mxu1 %v3213_v39  ;;  %v2004_v39 = vld [vmem:[#allocation3 + $0xd0] sm:$0xff] }
 0x841   : > { %2159 = vmatprep.mubr.bf16.mxu0 %v2685_v58  ;;  %2200 = vmatprep.mubr.bf16.mxu1 %v2685_v58 }
 0x843   : > { %2130 = vmatpush1.bf16.msra.mxu0 %v3218_v60  ;;  %2171 = vmatpush1.bf16.msra.mxu1 %v3229_v61 }
 0x844   : > { %2131 = vmatprep.subr.bf16.mxu0 %v3224_v62  ;;  %2172 = vmatprep.subr.bf16.mxu1 %v3234_v56 }
 0x847   : > { %2132 = vmatpush1.bf16.msra.mxu0 %v3240_v63  ;;  %2173 = vmatpush1.bf16.msra.mxu1 %v3250_v59 }
 0x848   : > { %2133 = vmatprep.subr.bf16.mxu0 %v3245_v57  ;;  %2174 = vmatprep.subr.bf16.mxu1 %v3255_v22 }
 0x84b   : > { %2134 = vmatpush1.bf16.msra.mxu0 %v3261_v52  ;;  %2175 = vmatpush1.bf16.msra.mxu1 %v3271_v55 }
 0x84c   : > { %2135 = vmatprep.subr.bf16.mxu0 %v3266_v53  ;;  %2176 = vmatprep.subr.bf16.mxu1 %v3276_v18  ;;  %v2006_v53 = vld [vmem:[#allocation3 + $0x28] sm:$0xff]  ;;  %v2005_v18 = vld [vmem:[#allocation3 + $0x10] sm:$0xff] }
 0x84f   : > { %2136 = vmatpush1.bf16.msra.mxu0 %v3281_v48  ;;  %2177 = vmatpush1.bf16.msra.mxu1 %v3291_v13 }
 0x850   : > { %2137 = vmatprep.subr.bf16.mxu0 %v3286_v12  ;;  %2178 = vmatprep.subr.bf16.mxu1 %v3296_v8 }
 0x853   : > { %2138 = vmatpush1.bf16.msra.mxu0 %v3301_v9  ;;  %2179 = vmatpush1.bf16.msra.mxu1 %v3311_v5 }
 0x854   : > { %2139 = vmatprep.subr.bf16.mxu0 %v3306_v4  ;;  %2180 = vmatprep.subr.bf16.mxu1 %v3316_v2 }
 0x857   : > { %2140 = vmatpush1.bf16.msra.mxu0 %v3321_v3  ;;  %2181 = vmatpush1.bf16.msra.mxu1 %v3331_v40 }
 0x858   : > { %2141 = vmatprep.subr.bf16.mxu0 %v3326_v44  ;;  %2182 = vmatprep.subr.bf16.mxu1 %v3336_v51 }
 0x85b   : > { %2142 = vmatpush1.bf16.msra.mxu0 %v3341_v35  ;;  %2183 = vmatpush1.bf16.msra.mxu1 %v3347_v36 }
 0x8fe   : > { %v2041_v43 = vpop.f32.mrf.mxu0  ;;  %v2082_v32 = vpop.f32.mrf.mxu1 }
 0x8ff   : > { %v2089_v60 = vadd.f32 %v2041_v43, %v2003_v41  ;;  %v2091_v13 = vadd.f32 %v2082_v32, %v2005_v18 }
 0x900   : > { %v2043_v62 = vpop.f32.mrf.mxu0  ;;  %v2084_v61 = vpop.f32.mrf.mxu1 }
 0x901   : > { %v2484_v56 = vmul.f32 -1.442695, %v2089_v60  ;;  %v2090_v58 = vadd.f32 %v2043_v62, %v2004_v39  ;;  %v2092_v55 = vadd.f32 %v2084_v61, %v2006_v53 }
 0x902   : > { %v2045_v63 = vpop.f32.mrf.mxu0  ;;  %v2086_v57 = vpop.f32.mrf.mxu1 }
 0x903   : > { %2627 = vpow2.f32 %v2484_v56  ;;  %v2485_v59 = vmul.f32 -1.442695, %v2090_v58  ;;  %v2486_v48 = vmul.f32 -1.442695, %v2092_v55 }
 0x904   : > { %v2046_v22 = vpop.f32.mrf.mxu0  ;;  %v2087_v52 = vpop.f32.mrf.mxu1 }
 0x905   : > { %2629 = vpow2.f32 %v2485_v59 }
 0x906   : > { %2631 = vpow2.f32 %v2486_v48 }
 0x910   : > { %v2628_v12 = vpop.eup %2627 }
 0x911   : > { %v2096_v8 = vadd.f32 1.0, %v2628_v12 }
 0x912   : > { %v2630_v9 = vpop.eup %2629 }
 0x913   : > { %2633 = vrcp.f32 %v2096_v8  ;;  %v2102_v4 = vadd.f32 1.0, %v2630_v9  ;;  %v2632_v5 = vpop.eup %2631 }
 0x914   : > { %2635 = vtanh.f32 %v2091_v13  ;;  %v2109_v40 = vadd.f32 1.0, %v2632_v5 }
 0x915   : > { %2637 = vrcp.f32 %v2102_v4 }
 0x916   : > { %2639 = vrcp.f32 %v2109_v40 }
 0x920   : > { %v2634_v2 = vpop.eup %2633 }
 0x921   : > { %v2636_v3 = vpop.eup %2635 }
 0x922   : > { %v2638_v44 = vpop.eup %2637  ;;  %v2113_v51 = vmul.f32 %v2636_v3, %v2634_v2 }
 0x923   : > { %v2112_v35 = vmul.f32 %v2638_v44, %v3580_v50  ;;  %v2640_v34 = vpop.eup %2639 }
 0x925   : > { %v2114_v36 = vadd.f32 %v2113_v51, %v2112_v35 }
 0x927   : > { %2641 = vtanh.f32 %v2114_v36 }
 0x934   : > { %v2642_v10 = vpop.eup %2641 }
 0x935   : > { %v2116_v11 = vmul.f32 %v2642_v10, %v2640_v34 }
 0x937   : > { %v2117_v0 = vpack.c.bf16 %v2116_v11, %v2116_v11 }
 0x939   : > { %2119 = vst [vmem:[#allocation2 + $0x18] sm:$0xf] %v2117_v0  ;;  %2160 = vmatmul.mubr.bf16.vlgmr.msra.gmra.mxu0 %v2117_v0  ;;  %2201 = vmatmul.mubr.bf16.vlgmr.msra.gmra.mxu1 %v2117_v0 }
 0x9f9   : > { %v2161_v6 = vpop.f32.mrf.mxu0  ;;  %v2202_v7 = vpop.f32.mrf.mxu1 }
 0x9fa   : > { %v2209_v42 = vadd.f32 %v2161_v6, %v2123_v1  ;;  %v2211_v21 = vadd.f32 %v2202_v7, %v2125_v26 }
 0x9fb   : > { %v2163_v37 = vpop.f32.mrf.mxu0  ;;  %v2204_v45 = vpop.f32.mrf.mxu1 }
 0x9fc   : > { %v2487_v38 = vmul.f32 -1.442695, %v2209_v42  ;;  %v2210_v33 = vadd.f32 %v2163_v37, %v2124_v49  ;;  %v2212_v25 = vadd.f32 %v2204_v45, %v2126_v24 }
 0x9fd   : > { %v2165_v31 = vpop.f32.mrf.mxu0  ;;  %v2206_v28 = vpop.f32.mrf.mxu1 }
 0x9fe   : > { %2643 = vpow2.f32 %v2487_v38  ;;  %v2488_v46 = vmul.f32 -1.442695, %v2210_v33  ;;  %v2489_v27 = vmul.f32 -1.442695, %v2212_v25 }
 0x9ff   : > { %v2166_v29 = vpop.f32.mrf.mxu0  ;;  %v2207_v30 = vpop.f32.mrf.mxu1 }
 0xa00   : > { %2645 = vpow2.f32 %v2488_v46 }
 0xa01   : > { %2647 = vpow2.f32 %v2489_v27 }
 0xa0b   : > { %v2644_v20 = vpop.eup %2643 }
 0xa0c   : > { %v2216_v54 = vadd.f32 1.0, %v2644_v20 }
 0xa0d   : > { %v2646_v23 = vpop.eup %2645 }
 0xa0e   : > { %2649 = vrcp.f32 %v2216_v54  ;;  %v2222_v16 = vadd.f32 1.0, %v2646_v23  ;;  %v2648_v17 = vpop.eup %2647 }
 0xa0f   : > { %2651 = vtanh.f32 %v2211_v21  ;;  %v2229_v14 = vadd.f32 1.0, %v2648_v17 }
 0xa10   : > { %2653 = vrcp.f32 %v2222_v16 }
 0xa11   : > { %2655 = vrcp.f32 %v2229_v14 }
 0xa1b   : > { %v2650_v50 = vpop.eup %2649 }
 0xa1c   : > { %v2652_v19 = vpop.eup %2651 }
 0xa1d   : > { %v2654_v47 = vpop.eup %2653  ;;  %v2233_v15 = vmul.f32 %v2652_v19, %v2650_v50 }
 0xa1e   : > { %v2232_v41 = vmul.f32 %v2654_v47, %v2114_v36  ;;  %v2656_v32 = vpop.eup %2655 }
 0xa20   : > { %v2234_v43 = vadd.f32 %v2233_v15, %v2232_v41 }
 0xa22   : > { %2657 = vtanh.f32 %v2234_v43 }
 0xa2f   : > { %v2658_v39 = vpop.eup %2657 }
 0xa30   : > { %v2236_v60 = vmul.f32 %v2658_v39, %v2656_v32  ;;  %2243 = sbr.rel (%p2490_p7) target bundleno = 2614 (0xa36), region = 48 }
 0xa32   : > { %v2237_v62 = vpack.c.bf16 %v2236_v60, %v2236_v60 }
 0xa34   : > { %2239 = vst [vmem:[#allocation2 + $0x1c] sm:$0xf] %v2237_v62 }
 0xa35   : > { %2244 = vst [vmem:[%s3633_s4] sm:$0xff] %v2236_v60 }
 0xa36 PF: > { %s14_s17 = sadd.s32 1, %s2681_s17   ;;  %s3688_s15 = smov %s2677_s16 }
 0xa37   : > { %p11_p8 = scmp.ge.s32.totalorder %s14_s17, 4   ;;  %s3689_s16 = smov %s3691_s18 }
 0xa39   :  { %13 = sbr.rel (!%p11_p8) target bundleno = 2 (0x2), region = 102 }

</bundles_post_ra>
